<compile_context>
chip_gen: v6e
topology: v6e:2x2x1
jax: 0.10.0
libtpu: 0.0.40
codegen_flags: <defaults>
</compile_context>

<pallas_src>
import jax
import jax.numpy as jnp
from jax.experimental import pallas as pl
from jax.experimental.pallas import tpu as pltpu


# --------------------------------------------------------------------------
# Fused kernel: transformer block + value-column head + masked BCE partials
# (one block of Bb batch rows per grid step)
# --------------------------------------------------------------------------
def make_transformer_value_kernel(Bb, S, H, TK):
    N = Bb * S
    NKV = S // TK

    def kernel(mask_ref, lab_ref, x_ref,
               ln1g, ln1b, wq, wk, wv, wo, ln2g, ln2b,
               w1, b1, w2, b2, lnfg, lnfb, wcol,
               vlog_ref, num_ref, den_ref):
        f32 = jnp.float32
        bf16 = jnp.bfloat16

        def layer_norm(x, g, b):
            mu = jnp.mean(x, axis=-1, keepdims=True)
            var = jnp.mean((x - mu) ** 2, axis=-1, keepdims=True)
            return ((x - mu) * jax.lax.rsqrt(var + 1e-5)
                    * g[...].astype(f32) + b[...].astype(f32))

        # Residual stream in f32; all MXU operands in bf16 with f32 accumulation.
        # TODO(synk): on v6e/v7x the residual could stay in bf16 (bf16 VALU).
        x = x_ref[...].astype(f32).reshape(N, H)

        # --- causal self-attention (single head), KV-tiled online softmax ---
        hn = layer_norm(x, ln1g, ln1b).astype(bf16)
        # wq already carries the 1/sqrt(H) scale (folded host-side).
        q = jnp.dot(hn, wq[...], preferred_element_type=f32).reshape(Bb, S, H).astype(bf16)
        k = jnp.dot(hn, wk[...], preferred_element_type=f32).reshape(Bb, S, H).astype(bf16)
        v = jnp.dot(hn, wv[...], preferred_element_type=f32).reshape(Bb, S, H).astype(bf16)

        q_pos = jax.lax.broadcasted_iota(jnp.int32, (Bb, S, TK), 1)
        k_iota = jax.lax.broadcasted_iota(jnp.int32, (Bb, S, TK), 2)

        m_i = jnp.full((Bb, S, 1), -1e30, f32)
        l_i = jnp.zeros((Bb, S, 1), f32)
        acc = jnp.zeros((Bb, S, H), f32)
        # TODO(synk): for very long S this unrolled KV loop should become an
        # extra "arbitrary" grid axis; NKV = S / min(S, 256) stays small here.
        for t in range(NKV):
            k_t = k[:, t * TK:(t + 1) * TK, :]
            v_t = v[:, t * TK:(t + 1) * TK, :]
            s = jnp.einsum('bqd,bkd->bqk', q, k_t, preferred_element_type=f32)
            s = jnp.where(q_pos >= (k_iota + t * TK), s, -1e30)
            m_new = jnp.maximum(m_i, jnp.max(s, axis=-1, keepdims=True))
            alpha = jnp.exp(m_i - m_new)
            p = jnp.exp(s - m_new)
            l_i = alpha * l_i + jnp.sum(p, axis=-1, keepdims=True)
            acc = alpha * acc + jnp.einsum('bqk,bkd->bqd', p.astype(bf16), v_t,
                                           preferred_element_type=f32)
            m_i = m_new
        attn = acc * pl.reciprocal(l_i, approx=True)
        x = x + jnp.dot(attn.reshape(N, H).astype(bf16), wo[...],
                        preferred_element_type=f32)

        # --- MLP ---
        hn2 = layer_norm(x, ln2g, ln2b).astype(bf16)
        h1 = jnp.dot(hn2, w1[...], preferred_element_type=f32) + b1[...].astype(f32)
        # TODO(synk): PyTorch nn.GELU defaults to exact erf; tanh approximation
        # is used here (HF "gelu_new" style) to keep the EUP path simple.
        h1 = jax.nn.gelu(h1, approximate=True)
        x = x + jnp.dot(h1.astype(bf16), w2[...],
                        preferred_element_type=f32) + b2[...].astype(f32)

        # --- final LN + value-token head column (lane-dense (Bb,1,S) store) ---
        # Only the value column of the LM head is needed; the (B,S,V) logits
        # and the previous (B,S,128) f32 slab are never materialized.
        hf3 = layer_norm(x, lnfg, lnfb).reshape(Bb, S, H)
        wc = wcol[...].astype(f32).reshape(1, 1, H)
        vlog = jnp.sum(hf3 * wc, axis=-1)            # (Bb, S), tokens on lanes
        vlog_ref[...] = vlog[:, None, :]             # f32 (Bb, 1, S)

        # --- fused masked BCE-with-logits partial sums ---
        msk = mask_ref[...].reshape(Bb, S)           # precomputed host-side
        y = lab_ref[...].reshape(Bb, 1)
        z = vlog
        per = jnp.maximum(z, 0.0) - z * y + jnp.log(1.0 + jnp.exp(-jnp.abs(z)))
        ones = jnp.ones((1, 1, 128), f32)
        num_ref[...] = ones * jnp.sum(per * msk)
        den_ref[...] = ones * jnp.sum(msk)

    return kernel


# --------------------------------------------------------------------------
# Block-size / VMEM heuristics
# --------------------------------------------------------------------------
def _choose_kv_tile(S):
    for tk in (256, 128):
        if S % tk == 0:
            return tk
    return S


def _block_vmem_bytes(bb, S, H, FF, tk):
    n = bb * S
    return int(n * H * (4 * 4 + 2 * 6)          # f32 residual/acc + bf16 activations
               + bb * S * tk * 4 * 3            # attention score/prob tiles
               + n * FF * 6                     # MLP intermediate (f32 + bf16)
               + 2 * (n * H * 2 + n * 4         # double-buffered x_emb in / vlog out
                      + S * 4 + 2 * 128 * 4))


def _choose_block_batch(B, S, H, FF, tk, weight_bytes, vmem_budget=44 * 2**20):
    budget = max(vmem_budget - weight_bytes, 4 * 2**20)
    best = None
    for bb in range(1, B + 1):
        if B % bb:
            continue
        nb = B // bb
        if B >= 2 and nb < 2:
            continue                             # keep >=2 grid steps (v7x megacore)
        if _block_vmem_bytes(bb, S, H, FF, tk) > budget:
            continue
        n = bb * S
        align = 2 if n % 256 == 0 else (1 if n % 128 == 0 else 0)
        key = (align, n)
        if best is None or key > best[0]:
            best = (key, bb)
    return 1 if best is None else best[1]


# --------------------------------------------------------------------------
# ValueModel.forward equivalent
# --------------------------------------------------------------------------
def value_model_forward(params, input_ids, labels,
                        newline_token_ids, value_token_id,
                        attention_mask=None):
    # TODO(synk): attention_mask padding is not implemented (assumed all-ones).
    del attention_mask
    f32, bf16 = jnp.float32, jnp.bfloat16
    B, S = input_ids.shape
    H = params["wq"].shape[0]
    FF = params["w1"].shape[1]

    ids = input_ids.astype(jnp.int32)

    # newline / position mask precomputed once (shared by kernel BCE & caller)
    nl = jnp.zeros((B, S), dtype=bool)
    for t in newline_token_ids:
        nl = nl | (ids == t)
    mask_f = (nl & (jnp.arange(S)[None, :] < (S - 1))).astype(f32)[:, None, :]

    labs = labels.reshape(B, 1, 1).astype(f32)
    x_emb = jnp.take(params["embed"], ids, axis=0)             # (B, S, H) bf16

    # fold 1/sqrt(H) into wq; keep only the value-token column of the head
    scale = 1.0 / (H ** 0.5)
    wq_s = (params["wq"].astype(f32) * scale).astype(bf16)
    wcol = params["whead"][:, value_token_id][None, :]         # (1, H) bf16

    w_args = [params["ln1_g"], params["ln1_b"], wq_s, params["wk"], params["wv"],
              params["wo"], params["ln2_g"], params["ln2_b"],
              params["w1"], params["b1"], params["w2"], params["b2"],
              params["lnf_g"], params["lnf_b"], wcol]
    weight_bytes = sum(int(w.size) * w.dtype.itemsize for w in w_args)
    # weights stay resident in VMEM for the whole call (single copy, no
    # per-grid-step double buffering)
    w_specs = [pl.BlockSpec(memory_space=pltpu.MemorySpace.VMEM) for _ in w_args]

    TK = _choose_kv_tile(S)
    Bb = _choose_block_batch(B, S, H, FF, TK, weight_bytes)
    NB = B // Bb

    vmem_limit = int(min(60 * 2**20,
                         max(16 * 2**20,
                             2 * (_block_vmem_bytes(Bb, S, H, FF, TK)
                                  + weight_bytes))))
    flops = int(2 * B * S * H * (4 * H + 2 * FF + 1) + 4 * B * S * S * H)
    transcendentals = int(2 * B * S * S + 2 * B * S * FF + 4 * B * S)
    bytes_accessed = int(x_emb.size * 2 + B * S * 8 + B * 4
                         + weight_bytes + B * S * 4 + 2 * NB * 128 * 4)

    vlog3, num_p, den_p = pl.pallas_call(
        make_transformer_value_kernel(Bb, S, H, TK),
        out_shape=(jax.ShapeDtypeStruct((B, 1, S), f32),
                   jax.ShapeDtypeStruct((NB, 1, 128), f32),
                   jax.ShapeDtypeStruct((NB, 1, 128), f32)),
        grid=(NB,),
        in_specs=[pl.BlockSpec((Bb, 1, S), lambda b: (b, 0, 0)),
                  pl.BlockSpec((Bb, 1, 1), lambda b: (b, 0, 0)),
                  pl.BlockSpec((Bb, S, H), lambda b: (b, 0, 0))] + w_specs,
        out_specs=(pl.BlockSpec((Bb, 1, S), lambda b: (b, 0, 0)),
                   pl.BlockSpec((1, 1, 128), lambda b: (b, 0, 0)),
                   pl.BlockSpec((1, 1, 128), lambda b: (b, 0, 0))),
        compiler_params=pltpu.CompilerParams(
            dimension_semantics=("parallel",),
            vmem_limit_bytes=vmem_limit),
        cost_estimate=pl.CostEstimate(flops=flops,
                                      transcendentals=transcendentals,
                                      bytes_accessed=bytes_accessed),
    )(mask_f, labs, x_emb, *w_args)

    logits_value = vlog3[:, 0, :]                              # (B, S) f32
    loss = jnp.sum(num_p[:, 0, 0]) / jnp.maximum(jnp.sum(den_p[:, 0, 0]), 1.0)

    # TODO(synk): torch's boolean-mask gather (logits_value[:, :-1][mask])
    # yields a data-dependent shape; we return dense trimmed logits + mask.
    return {"loss": loss,
            "logits_value_trim": logits_value[:, :-1],
            "newline_mask": nl[:, :-1]}


# --------------------------------------------------------------------------
# Deterministic parameter init (synthetic, bf16 like torch_dtype=bfloat16)
# --------------------------------------------------------------------------
def init_params(key, V, H, FF):
    ks = jax.random.split(key, 8)
    bf16 = jnp.bfloat16

    def w(k, shape):
        return (jax.random.normal(k, shape) * 0.02).astype(bf16)

    return {
        "embed": w(ks[0], (V, H)),
        "ln1_g": jnp.ones((1, H), bf16), "ln1_b": jnp.zeros((1, H), bf16),
        "wq": w(ks[1], (H, H)), "wk": w(ks[2], (H, H)), "wv": w(ks[3], (H, H)),
        "wo": w(ks[4], (H, H)),
        "ln2_g": jnp.ones((1, H), bf16), "ln2_b": jnp.zeros((1, H), bf16),
        "w1": w(ks[5], (H, FF)), "b1": jnp.zeros((1, FF), bf16),
        "w2": w(ks[6], (FF, H)), "b2": jnp.zeros((1, H), bf16),
        "lnf_g": jnp.ones((1, H), bf16), "lnf_b": jnp.zeros((1, H), bf16),
        "whead": w(ks[7], (H, V)),
    }


if __name__ == "__main__":
    B, S, H, V, FF = 2, 8, 32, 64, 128
    newline_token_ids = [3, 7]
    value_token_id = 5

    key = jax.random.PRNGKey(0)
    k_ids, k_lab, k_par = jax.random.split(key, 3)

    params = init_params(k_par, V, H, FF)

    input_ids = jax.random.randint(k_ids, (B, S), 0, V, dtype=jnp.int32)
    # guarantee some newline tokens so the masked selection is non-empty
    input_ids = input_ids.at[:, 2].set(newline_token_ids[0])
    input_ids = input_ids.at[:, 5].set(newline_token_ids[1])
    labels = jax.random.uniform(k_lab, (B,), dtype=jnp.float32)

    out = value_model_forward(params, input_ids, labels,
                              newline_token_ids, value_token_id)
    jax.block_until_ready(out)
    assert bool(jnp.isfinite(out["loss"]))
    print("KERNEL_OK")
</pallas_src>

<mosaic_0001>
module attributes {stable_mosaic.version = 11 : i64} {
  func.func @kernel(%arg0: i32, %arg1: memref<1x1x8xf32, #tpu.memory_space<vmem>>, %arg2: memref<1x1x1xf32, #tpu.memory_space<vmem>>, %arg3: memref<1x8x32xbf16, #tpu.memory_space<vmem>>, %arg4: memref<1x32xbf16, #tpu.memory_space<vmem>>, %arg5: memref<1x32xbf16, #tpu.memory_space<vmem>>, %arg6: memref<32x32xbf16, #tpu.memory_space<vmem>>, %arg7: memref<32x32xbf16, #tpu.memory_space<vmem>>, %arg8: memref<32x32xbf16, #tpu.memory_space<vmem>>, %arg9: memref<32x32xbf16, #tpu.memory_space<vmem>>, %arg10: memref<1x32xbf16, #tpu.memory_space<vmem>>, %arg11: memref<1x32xbf16, #tpu.memory_space<vmem>>, %arg12: memref<32x128xbf16, #tpu.memory_space<vmem>>, %arg13: memref<1x128xbf16, #tpu.memory_space<vmem>>, %arg14: memref<128x32xbf16, #tpu.memory_space<vmem>>, %arg15: memref<1x32xbf16, #tpu.memory_space<vmem>>, %arg16: memref<1x32xbf16, #tpu.memory_space<vmem>>, %arg17: memref<1x32xbf16, #tpu.memory_space<vmem>>, %arg18: memref<1x32xbf16, #tpu.memory_space<vmem>>, %arg19: memref<1x1x8xf32, #tpu.memory_space<vmem>>, %arg20: memref<1x1x128xf32, #tpu.memory_space<vmem>>, %arg21: memref<1x1x128xf32, #tpu.memory_space<vmem>>) attributes {dimension_semantics = [#tpu.dimension_semantics<parallel>], iteration_bounds = array<i64: 2>, scalar_prefetch = 0 : i64, scratch_operands = 0 : i64, tpu.core_type = #tpu.core_type<tc>, window_params = [{transform_indices = @transform_0, window_bounds = array<i64: 1, 1, 8>}, {transform_indices = @transform_1, window_bounds = array<i64: 1, 1, 1>}, {transform_indices = @transform_2, window_bounds = array<i64: 1, 8, 32>}, {pipeline_mode = #tpu.pipeline_mode<synchronous>, transform_indices = @transform_3, window_bounds = array<i64: 1, 32>}, {pipeline_mode = #tpu.pipeline_mode<synchronous>, transform_indices = @transform_4, window_bounds = array<i64: 1, 32>}, {pipeline_mode = #tpu.pipeline_mode<synchronous>, transform_indices = @transform_5, window_bounds = array<i64: 32, 32>}, {pipeline_mode = #tpu.pipeline_mode<synchronous>, transform_indices = @transform_6, window_bounds = array<i64: 32, 32>}, {pipeline_mode = #tpu.pipeline_mode<synchronous>, transform_indices = @transform_7, window_bounds = array<i64: 32, 32>}, {pipeline_mode = #tpu.pipeline_mode<synchronous>, transform_indices = @transform_8, window_bounds = array<i64: 32, 32>}, {pipeline_mode = #tpu.pipeline_mode<synchronous>, transform_indices = @transform_9, window_bounds = array<i64: 1, 32>}, {pipeline_mode = #tpu.pipeline_mode<synchronous>, transform_indices = @transform_10, window_bounds = array<i64: 1, 32>}, {pipeline_mode = #tpu.pipeline_mode<synchronous>, transform_indices = @transform_11, window_bounds = array<i64: 32, 128>}, {pipeline_mode = #tpu.pipeline_mode<synchronous>, transform_indices = @transform_12, window_bounds = array<i64: 1, 128>}, {pipeline_mode = #tpu.pipeline_mode<synchronous>, transform_indices = @transform_13, window_bounds = array<i64: 128, 32>}, {pipeline_mode = #tpu.pipeline_mode<synchronous>, transform_indices = @transform_14, window_bounds = array<i64: 1, 32>}, {pipeline_mode = #tpu.pipeline_mode<synchronous>, transform_indices = @transform_15, window_bounds = array<i64: 1, 32>}, {pipeline_mode = #tpu.pipeline_mode<synchronous>, transform_indices = @transform_16, window_bounds = array<i64: 1, 32>}, {pipeline_mode = #tpu.pipeline_mode<synchronous>, transform_indices = @transform_17, window_bounds = array<i64: 1, 32>}, {transform_indices = @transform_18, window_bounds = array<i64: 1, 1, 8>}, {transform_indices = @transform_19, window_bounds = array<i64: 1, 1, 128>}, {transform_indices = @transform_20, window_bounds = array<i64: 1, 1, 128>}]} {
    %c0 = arith.constant 0 : index
    %c0_0 = arith.constant 0 : index
    %c0_1 = arith.constant 0 : index
    %0 = vector.load %arg3[%c0, %c0_0, %c0_1] : memref<1x8x32xbf16, #tpu.memory_space<vmem>>, vector<1x8x32xbf16>
    %1 = arith.extf %0 : vector<1x8x32xbf16> to vector<1x8x32xf32>
    %2 = vector.shape_cast %1 : vector<1x8x32xf32> to vector<8x32xf32>
    %cst = arith.constant dense<0.000000e+00> : vector<8xf32>
    %3 = vector.multi_reduction <add>, %2, %cst [1] : vector<8x32xf32> to vector<8xf32>
    %4 = vector.shape_cast %3 : vector<8xf32> to vector<8x1xf32>
    %cst_2 = arith.constant 3.200000e+01 : f32
    %5 = vector.broadcast %cst_2 : f32 to vector<8x1xf32>
    %6 = arith.divf %4, %5 : vector<8x1xf32>
    %7 = vector.broadcast %6 : vector<8x1xf32> to vector<8x32xf32>
    %8 = arith.subf %2, %7 : vector<8x32xf32>
    %9 = arith.mulf %8, %8 : vector<8x32xf32>
    %cst_3 = arith.constant dense<0.000000e+00> : vector<8xf32>
    %10 = vector.multi_reduction <add>, %9, %cst_3 [1] : vector<8x32xf32> to vector<8xf32>
    %11 = vector.shape_cast %10 : vector<8xf32> to vector<8x1xf32>
    %cst_4 = arith.constant 3.200000e+01 : f32
    %12 = vector.broadcast %cst_4 : f32 to vector<8x1xf32>
    %13 = arith.divf %11, %12 : vector<8x1xf32>
    %14 = vector.broadcast %6 : vector<8x1xf32> to vector<8x32xf32>
    %15 = arith.subf %2, %14 : vector<8x32xf32>
    %cst_5 = arith.constant 9.99999974E-6 : f32
    %16 = vector.broadcast %cst_5 : f32 to vector<8x1xf32>
    %17 = arith.addf %13, %16 : vector<8x1xf32>
    %18 = math.rsqrt %17 : vector<8x1xf32>
    %19 = vector.broadcast %18 : vector<8x1xf32> to vector<8x32xf32>
    %20 = arith.mulf %15, %19 : vector<8x32xf32>
    %c0_6 = arith.constant 0 : index
    %c0_7 = arith.constant 0 : index
    %21 = vector.load %arg4[%c0_6, %c0_7] : memref<1x32xbf16, #tpu.memory_space<vmem>>, vector<1x32xbf16>
    %22 = arith.extf %21 : vector<1x32xbf16> to vector<1x32xf32>
    %23 = vector.broadcast %22 : vector<1x32xf32> to vector<8x32xf32>
    %24 = arith.mulf %20, %23 : vector<8x32xf32>
    %c0_8 = arith.constant 0 : index
    %c0_9 = arith.constant 0 : index
    %25 = vector.load %arg5[%c0_8, %c0_9] : memref<1x32xbf16, #tpu.memory_space<vmem>>, vector<1x32xbf16>
    %26 = arith.extf %25 : vector<1x32xbf16> to vector<1x32xf32>
    %27 = vector.broadcast %26 : vector<1x32xf32> to vector<8x32xf32>
    %28 = arith.addf %24, %27 : vector<8x32xf32>
    %29 = arith.truncf %28 : vector<8x32xf32> to vector<8x32xbf16>
    %c0_10 = arith.constant 0 : index
    %c0_11 = arith.constant 0 : index
    %30 = vector.load %arg6[%c0_10, %c0_11] : memref<32x32xbf16, #tpu.memory_space<vmem>>, vector<32x32xbf16>
    %cst_12 = arith.constant dense<0.000000e+00> : vector<8x32xf32>
    %31 = tpu.matmul %29, %30, %cst_12 {dimension_numbers = #tpu.dot_dimension_numbers<[1], [0], [0], [1], [0, 0, 1, 1], [], []>} : vector<8x32xbf16>, vector<32x32xbf16>, vector<8x32xf32> -> vector<8x32xf32>
    %32 = vector.shape_cast %31 : vector<8x32xf32> to vector<1x8x32xf32>
    %33 = arith.truncf %32 : vector<1x8x32xf32> to vector<1x8x32xbf16>
    %c0_13 = arith.constant 0 : index
    %c0_14 = arith.constant 0 : index
    %34 = vector.load %arg7[%c0_13, %c0_14] : memref<32x32xbf16, #tpu.memory_space<vmem>>, vector<32x32xbf16>
    %cst_15 = arith.constant dense<0.000000e+00> : vector<8x32xf32>
    %35 = tpu.matmul %29, %34, %cst_15 {dimension_numbers = #tpu.dot_dimension_numbers<[1], [0], [0], [1], [0, 0, 1, 1], [], []>} : vector<8x32xbf16>, vector<32x32xbf16>, vector<8x32xf32> -> vector<8x32xf32>
    %36 = vector.shape_cast %35 : vector<8x32xf32> to vector<1x8x32xf32>
    %37 = arith.truncf %36 : vector<1x8x32xf32> to vector<1x8x32xbf16>
    %c0_16 = arith.constant 0 : index
    %c0_17 = arith.constant 0 : index
    %38 = vector.load %arg8[%c0_16, %c0_17] : memref<32x32xbf16, #tpu.memory_space<vmem>>, vector<32x32xbf16>
    %cst_18 = arith.constant dense<0.000000e+00> : vector<8x32xf32>
    %39 = tpu.matmul %29, %38, %cst_18 {dimension_numbers = #tpu.dot_dimension_numbers<[1], [0], [0], [1], [0, 0, 1, 1], [], []>} : vector<8x32xbf16>, vector<32x32xbf16>, vector<8x32xf32> -> vector<8x32xf32>
    %40 = vector.shape_cast %39 : vector<8x32xf32> to vector<1x8x32xf32>
    %41 = arith.truncf %40 : vector<1x8x32xf32> to vector<1x8x32xbf16>
    %42 = tpu.iota {dimensions = array<i32: 1>} : vector<1x8x8xi32>
    %43 = tpu.iota {dimensions = array<i32: 2>} : vector<1x8x8xi32>
    %cst_19 = arith.constant -1.000000e+30 : f32
    %44 = vector.broadcast %cst_19 : f32 to vector<1x8x1xf32>
    %cst_20 = arith.constant 0.000000e+00 : f32
    %45 = vector.broadcast %cst_20 : f32 to vector<1x8x1xf32>
    %cst_21 = arith.constant 0.000000e+00 : f32
    %46 = vector.broadcast %cst_21 : f32 to vector<1x8x32xf32>
    "tpu.trace_start"() <{level = 10 : i32, message = "bqd,bkd->bqk"}> : () -> ()
    %cst_22 = arith.constant dense<0.000000e+00> : vector<1x8x8xf32>
    %47 = tpu.matmul %33, %37, %cst_22 {dimension_numbers = #tpu.dot_dimension_numbers<[2], [2], [1], [1], [0, 0, 0, 1, 1, 1], [0], [0]>} : vector<1x8x32xbf16>, vector<1x8x32xbf16>, vector<1x8x8xf32> -> vector<1x8x8xf32>
    "tpu.trace_stop"() : () -> ()
    %c0_i32 = arith.constant 0 : i32
    %48 = vector.broadcast %c0_i32 : i32 to vector<1x8x8xi32>
    %49 = arith.addi %43, %48 : vector<1x8x8xi32>
    %50 = arith.cmpi sge, %42, %49 : vector<1x8x8xi32>
    %cst_23 = arith.constant -1.000000e+30 : f32
    %51 = vector.broadcast %cst_23 : f32 to vector<1x8x8xf32>
    %52 = arith.select %50, %47, %51 : vector<1x8x8xi1>, vector<1x8x8xf32>
    %cst_24 = arith.constant dense<0xFF800000> : vector<1x8xf32>
    %53 = vector.multi_reduction <maximumf>, %52, %cst_24 [2] : vector<1x8x8xf32> to vector<1x8xf32>
    %54 = vector.shape_cast %53 : vector<1x8xf32> to vector<1x8x1xf32>
    %55 = arith.maximumf %44, %54 : vector<1x8x1xf32>
    %56 = arith.subf %44, %55 : vector<1x8x1xf32>
    %57 = math.exp %56 : vector<1x8x1xf32>
    %58 = vector.broadcast %55 : vector<1x8x1xf32> to vector<1x8x8xf32>
    %59 = arith.subf %52, %58 : vector<1x8x8xf32>
    %60 = math.exp %59 : vector<1x8x8xf32>
    %61 = arith.mulf %57, %45 : vector<1x8x1xf32>
    %cst_25 = arith.constant dense<0.000000e+00> : vector<1x8xf32>
    %62 = vector.multi_reduction <add>, %60, %cst_25 [2] : vector<1x8x8xf32> to vector<1x8xf32>
    %63 = vector.shape_cast %62 : vector<1x8xf32> to vector<1x8x1xf32>
    %64 = arith.addf %61, %63 : vector<1x8x1xf32>
    %65 = vector.broadcast %57 : vector<1x8x1xf32> to vector<1x8x32xf32>
    %66 = arith.mulf %65, %46 : vector<1x8x32xf32>
    %67 = arith.truncf %60 : vector<1x8x8xf32> to vector<1x8x8xbf16>
    "tpu.trace_start"() <{level = 10 : i32, message = "bqk,bkd->bqd"}> : () -> ()
    %cst_26 = arith.constant dense<0.000000e+00> : vector<1x8x32xf32>
    %68 = tpu.matmul %67, %41, %cst_26 {dimension_numbers = #tpu.dot_dimension_numbers<[2], [1], [1], [2], [0, 0, 0, 1, 1, 2], [0], [0]>} : vector<1x8x8xbf16>, vector<1x8x32xbf16>, vector<1x8x32xf32> -> vector<1x8x32xf32>
    "tpu.trace_stop"() : () -> ()
    %69 = arith.addf %66, %68 : vector<1x8x32xf32>
    %70 = tpu.reciprocal %64 {approx = true} : vector<1x8x1xf32> -> vector<1x8x1xf32>
    %71 = vector.broadcast %70 : vector<1x8x1xf32> to vector<1x8x32xf32>
    %72 = arith.mulf %69, %71 : vector<1x8x32xf32>
    %73 = vector.shape_cast %72 : vector<1x8x32xf32> to vector<8x32xf32>
    %74 = arith.truncf %73 : vector<8x32xf32> to vector<8x32xbf16>
    %c0_27 = arith.constant 0 : index
    %c0_28 = arith.constant 0 : index
    %75 = vector.load %arg9[%c0_27, %c0_28] : memref<32x32xbf16, #tpu.memory_space<vmem>>, vector<32x32xbf16>
    %cst_29 = arith.constant dense<0.000000e+00> : vector<8x32xf32>
    %76 = tpu.matmul %74, %75, %cst_29 {dimension_numbers = #tpu.dot_dimension_numbers<[1], [0], [0], [1], [0, 0, 1, 1], [], []>} : vector<8x32xbf16>, vector<32x32xbf16>, vector<8x32xf32> -> vector<8x32xf32>
    %77 = arith.addf %2, %76 : vector<8x32xf32>
    %cst_30 = arith.constant dense<0.000000e+00> : vector<8xf32>
    %78 = vector.multi_reduction <add>, %77, %cst_30 [1] : vector<8x32xf32> to vector<8xf32>
    %79 = vector.shape_cast %78 : vector<8xf32> to vector<8x1xf32>
    %cst_31 = arith.constant 3.200000e+01 : f32
    %80 = vector.broadcast %cst_31 : f32 to vector<8x1xf32>
    %81 = arith.divf %79, %80 : vector<8x1xf32>
    %82 = vector.broadcast %81 : vector<8x1xf32> to vector<8x32xf32>
    %83 = arith.subf %77, %82 : vector<8x32xf32>
    %84 = arith.mulf %83, %83 : vector<8x32xf32>
    %cst_32 = arith.constant dense<0.000000e+00> : vector<8xf32>
    %85 = vector.multi_reduction <add>, %84, %cst_32 [1] : vector<8x32xf32> to vector<8xf32>
    %86 = vector.shape_cast %85 : vector<8xf32> to vector<8x1xf32>
    %cst_33 = arith.constant 3.200000e+01 : f32
    %87 = vector.broadcast %cst_33 : f32 to vector<8x1xf32>
    %88 = arith.divf %86, %87 : vector<8x1xf32>
    %89 = vector.broadcast %81 : vector<8x1xf32> to vector<8x32xf32>
    %90 = arith.subf %77, %89 : vector<8x32xf32>
    %cst_34 = arith.constant 9.99999974E-6 : f32
    %91 = vector.broadcast %cst_34 : f32 to vector<8x1xf32>
    %92 = arith.addf %88, %91 : vector<8x1xf32>
    %93 = math.rsqrt %92 : vector<8x1xf32>
    %94 = vector.broadcast %93 : vector<8x1xf32> to vector<8x32xf32>
    %95 = arith.mulf %90, %94 : vector<8x32xf32>
    %c0_35 = arith.constant 0 : index
    %c0_36 = arith.constant 0 : index
    %96 = vector.load %arg10[%c0_35, %c0_36] : memref<1x32xbf16, #tpu.memory_space<vmem>>, vector<1x32xbf16>
    %97 = arith.extf %96 : vector<1x32xbf16> to vector<1x32xf32>
    %98 = vector.broadcast %97 : vector<1x32xf32> to vector<8x32xf32>
    %99 = arith.mulf %95, %98 : vector<8x32xf32>
    %c0_37 = arith.constant 0 : index
    %c0_38 = arith.constant 0 : index
    %100 = vector.load %arg11[%c0_37, %c0_38] : memref<1x32xbf16, #tpu.memory_space<vmem>>, vector<1x32xbf16>
    %101 = arith.extf %100 : vector<1x32xbf16> to vector<1x32xf32>
    %102 = vector.broadcast %101 : vector<1x32xf32> to vector<8x32xf32>
    %103 = arith.addf %99, %102 : vector<8x32xf32>
    %104 = arith.truncf %103 : vector<8x32xf32> to vector<8x32xbf16>
    %c0_39 = arith.constant 0 : index
    %c0_40 = arith.constant 0 : index
    %105 = vector.load %arg12[%c0_39, %c0_40] : memref<32x128xbf16, #tpu.memory_space<vmem>>, vector<32x128xbf16>
    %cst_41 = arith.constant dense<0.000000e+00> : vector<8x128xf32>
    %106 = tpu.matmul %104, %105, %cst_41 {dimension_numbers = #tpu.dot_dimension_numbers<[1], [0], [0], [1], [0, 0, 1, 1], [], []>} : vector<8x32xbf16>, vector<32x128xbf16>, vector<8x128xf32> -> vector<8x128xf32>
    %c0_42 = arith.constant 0 : index
    %c0_43 = arith.constant 0 : index
    %107 = vector.load %arg13[%c0_42, %c0_43] : memref<1x128xbf16, #tpu.memory_space<vmem>>, vector<1x128xbf16>
    %108 = arith.extf %107 : vector<1x128xbf16> to vector<1x128xf32>
    %109 = vector.broadcast %108 : vector<1x128xf32> to vector<8x128xf32>
    %110 = arith.addf %106, %109 : vector<8x128xf32>
    %111 = arith.mulf %110, %110 : vector<8x128xf32>
    %112 = arith.mulf %110, %111 : vector<8x128xf32>
    %cst_44 = arith.constant 4.471500e-02 : f32
    %113 = vector.broadcast %cst_44 : f32 to vector<8x128xf32>
    %114 = arith.mulf %113, %112 : vector<8x128xf32>
    %115 = arith.addf %110, %114 : vector<8x128xf32>
    %cst_45 = arith.constant 0.797884583 : f32
    %116 = vector.broadcast %cst_45 : f32 to vector<8x128xf32>
    %117 = arith.mulf %116, %115 : vector<8x128xf32>
    %118 = math.tanh %117 : vector<8x128xf32>
    %cst_46 = arith.constant 1.000000e+00 : f32
    %119 = vector.broadcast %cst_46 : f32 to vector<8x128xf32>
    %120 = arith.addf %119, %118 : vector<8x128xf32>
    %cst_47 = arith.constant 5.000000e-01 : f32
    %121 = vector.broadcast %cst_47 : f32 to vector<8x128xf32>
    %122 = arith.mulf %121, %120 : vector<8x128xf32>
    %123 = arith.mulf %110, %122 : vector<8x128xf32>
    %124 = arith.truncf %123 : vector<8x128xf32> to vector<8x128xbf16>
    %c0_48 = arith.constant 0 : index
    %c0_49 = arith.constant 0 : index
    %125 = vector.load %arg14[%c0_48, %c0_49] : memref<128x32xbf16, #tpu.memory_space<vmem>>, vector<128x32xbf16>
    %cst_50 = arith.constant dense<0.000000e+00> : vector<8x32xf32>
    %126 = tpu.matmul %124, %125, %cst_50 {dimension_numbers = #tpu.dot_dimension_numbers<[1], [0], [0], [1], [0, 0, 1, 1], [], []>} : vector<8x128xbf16>, vector<128x32xbf16>, vector<8x32xf32> -> vector<8x32xf32>
    %127 = arith.addf %77, %126 : vector<8x32xf32>
    %c0_51 = arith.constant 0 : index
    %c0_52 = arith.constant 0 : index
    %128 = vector.load %arg15[%c0_51, %c0_52] : memref<1x32xbf16, #tpu.memory_space<vmem>>, vector<1x32xbf16>
    %129 = arith.extf %128 : vector<1x32xbf16> to vector<1x32xf32>
    %130 = vector.broadcast %129 : vector<1x32xf32> to vector<8x32xf32>
    %131 = arith.addf %127, %130 : vector<8x32xf32>
    %cst_53 = arith.constant dense<0.000000e+00> : vector<8xf32>
    %132 = vector.multi_reduction <add>, %131, %cst_53 [1] : vector<8x32xf32> to vector<8xf32>
    %133 = vector.shape_cast %132 : vector<8xf32> to vector<8x1xf32>
    %cst_54 = arith.constant 3.200000e+01 : f32
    %134 = vector.broadcast %cst_54 : f32 to vector<8x1xf32>
    %135 = arith.divf %133, %134 : vector<8x1xf32>
    %136 = vector.broadcast %135 : vector<8x1xf32> to vector<8x32xf32>
    %137 = arith.subf %131, %136 : vector<8x32xf32>
    %138 = arith.mulf %137, %137 : vector<8x32xf32>
    %cst_55 = arith.constant dense<0.000000e+00> : vector<8xf32>
    %139 = vector.multi_reduction <add>, %138, %cst_55 [1] : vector<8x32xf32> to vector<8xf32>
    %140 = vector.shape_cast %139 : vector<8xf32> to vector<8x1xf32>
    %cst_56 = arith.constant 3.200000e+01 : f32
    %141 = vector.broadcast %cst_56 : f32 to vector<8x1xf32>
    %142 = arith.divf %140, %141 : vector<8x1xf32>
    %143 = vector.broadcast %135 : vector<8x1xf32> to vector<8x32xf32>
    %144 = arith.subf %131, %143 : vector<8x32xf32>
    %cst_57 = arith.constant 9.99999974E-6 : f32
    %145 = vector.broadcast %cst_57 : f32 to vector<8x1xf32>
    %146 = arith.addf %142, %145 : vector<8x1xf32>
    %147 = math.rsqrt %146 : vector<8x1xf32>
    %148 = vector.broadcast %147 : vector<8x1xf32> to vector<8x32xf32>
    %149 = arith.mulf %144, %148 : vector<8x32xf32>
    %c0_58 = arith.constant 0 : index
    %c0_59 = arith.constant 0 : index
    %150 = vector.load %arg16[%c0_58, %c0_59] : memref<1x32xbf16, #tpu.memory_space<vmem>>, vector<1x32xbf16>
    %151 = arith.extf %150 : vector<1x32xbf16> to vector<1x32xf32>
    %152 = vector.broadcast %151 : vector<1x32xf32> to vector<8x32xf32>
    %153 = arith.mulf %149, %152 : vector<8x32xf32>
    %c0_60 = arith.constant 0 : index
    %c0_61 = arith.constant 0 : index
    %154 = vector.load %arg17[%c0_60, %c0_61] : memref<1x32xbf16, #tpu.memory_space<vmem>>, vector<1x32xbf16>
    %155 = arith.extf %154 : vector<1x32xbf16> to vector<1x32xf32>
    %156 = vector.broadcast %155 : vector<1x32xf32> to vector<8x32xf32>
    %157 = arith.addf %153, %156 : vector<8x32xf32>
    %158 = vector.shape_cast %157 : vector<8x32xf32> to vector<1x8x32xf32>
    %c0_62 = arith.constant 0 : index
    %c0_63 = arith.constant 0 : index
    %159 = vector.load %arg18[%c0_62, %c0_63] : memref<1x32xbf16, #tpu.memory_space<vmem>>, vector<1x32xbf16>
    %160 = arith.extf %159 : vector<1x32xbf16> to vector<1x32xf32>
    %161 = vector.shape_cast %160 : vector<1x32xf32> to vector<1x1x32xf32>
    %162 = vector.broadcast %161 : vector<1x1x32xf32> to vector<1x8x32xf32>
    %163 = arith.mulf %158, %162 : vector<1x8x32xf32>
    %cst_64 = arith.constant dense<0.000000e+00> : vector<1x8xf32>
    %164 = vector.multi_reduction <add>, %163, %cst_64 [2] : vector<1x8x32xf32> to vector<1x8xf32>
    %165 = vector.shape_cast %164 : vector<1x8xf32> to vector<1x1x8xf32>
    %c0_65 = arith.constant 0 : index
    %c0_66 = arith.constant 0 : index
    %c0_67 = arith.constant 0 : index
    %166 = vector.load %arg19[%c0_65, %c0_66, %c0_67] : memref<1x1x8xf32, #tpu.memory_space<vmem>>, vector<1x1x8xf32>
    tpu.vector_store %arg19[%c0_65, %c0_66, %c0_67], %165 {strides = array<i32>} : memref<1x1x8xf32, #tpu.memory_space<vmem>>, vector<1x1x8xf32>,
    %c0_68 = arith.constant 0 : index
    %c0_69 = arith.constant 0 : index
    %c0_70 = arith.constant 0 : index
    %167 = vector.load %arg1[%c0_68, %c0_69, %c0_70] : memref<1x1x8xf32, #tpu.memory_space<vmem>>, vector<1x1x8xf32>
    %168 = vector.shape_cast %167 : vector<1x1x8xf32> to vector<1x8xf32>
    %c0_71 = arith.constant 0 : index
    %c0_72 = arith.constant 0 : index
    %c0_73 = arith.constant 0 : index
    %169 = vector.load %arg2[%c0_71, %c0_72, %c0_73] : memref<1x1x1xf32, #tpu.memory_space<vmem>>, vector<1x1x1xf32>
    %170 = vector.shape_cast %169 : vector<1x1x1xf32> to vector<1x1xf32>
    %cst_74 = arith.constant 0.000000e+00 : f32
    %171 = vector.broadcast %cst_74 : f32 to vector<1x8xf32>
    %172 = arith.maximumf %164, %171 : vector<1x8xf32>
    %173 = vector.broadcast %170 : vector<1x1xf32> to vector<1x8xf32>
    %174 = arith.mulf %164, %173 : vector<1x8xf32>
    %175 = arith.subf %172, %174 : vector<1x8xf32>
    %176 = math.absf %164 : vector<1x8xf32>
    %cst_75 = arith.constant 0.000000e+00 : f32
    %177 = vector.broadcast %cst_75 : f32 to vector<1x8xf32>
    %178 = arith.subf %177, %176 : vector<1x8xf32>
    %179 = math.exp %178 : vector<1x8xf32>
    %cst_76 = arith.constant 1.000000e+00 : f32
    %180 = vector.broadcast %cst_76 : f32 to vector<1x8xf32>
    %181 = arith.addf %180, %179 : vector<1x8xf32>
    %182 = math.log %181 : vector<1x8xf32>
    %183 = arith.addf %175, %182 : vector<1x8xf32>
    %cst_77 = arith.constant 1.000000e+00 : f32
    %184 = vector.broadcast %cst_77 : f32 to vector<1x1x128xf32>
    %185 = arith.mulf %183, %168 : vector<1x8xf32>
    %186 = vector.shape_cast %185 : vector<1x8xf32> to vector<1x1x8xf32>
    %cst_78 = arith.constant dense<0.000000e+00> : vector<1xf32>
    %187 = vector.multi_reduction <add>, %186, %cst_78 [1, 2] : vector<1x1x8xf32> to vector<1xf32>
    %188 = vector.shape_cast %187 : vector<1xf32> to vector<1x1x1xf32>
    %189 = vector.extract %188[0, 0, 0] : f32 from vector<1x1x1xf32>
    %190 = vector.broadcast %189 : f32 to vector<1x1x128xf32>
    %191 = arith.mulf %184, %190 : vector<1x1x128xf32>
    %c0_79 = arith.constant 0 : index
    %c0_80 = arith.constant 0 : index
    %c0_81 = arith.constant 0 : index
    %192 = vector.load %arg20[%c0_79, %c0_80, %c0_81] : memref<1x1x128xf32, #tpu.memory_space<vmem>>, vector<1x1x128xf32>
    tpu.vector_store %arg20[%c0_79, %c0_80, %c0_81], %191 {strides = array<i32>} : memref<1x1x128xf32, #tpu.memory_space<vmem>>, vector<1x1x128xf32>,
    %193 = vector.shape_cast %168 : vector<1x8xf32> to vector<1x1x8xf32>
    %cst_82 = arith.constant dense<0.000000e+00> : vector<1xf32>
    %194 = vector.multi_reduction <add>, %193, %cst_82 [1, 2] : vector<1x1x8xf32> to vector<1xf32>
    %195 = vector.shape_cast %194 : vector<1xf32> to vector<1x1x1xf32>
    %196 = vector.extract %195[0, 0, 0] : f32 from vector<1x1x1xf32>
    %197 = vector.broadcast %196 : f32 to vector<1x1x128xf32>
    %198 = arith.mulf %184, %197 : vector<1x1x128xf32>
    %c0_83 = arith.constant 0 : index
    %c0_84 = arith.constant 0 : index
    %c0_85 = arith.constant 0 : index
    %199 = vector.load %arg21[%c0_83, %c0_84, %c0_85] : memref<1x1x128xf32, #tpu.memory_space<vmem>>, vector<1x1x128xf32>
    tpu.vector_store %arg21[%c0_83, %c0_84, %c0_85], %198 {strides = array<i32>} : memref<1x1x128xf32, #tpu.memory_space<vmem>>, vector<1x1x128xf32>,
    return
  }
  func.func @transform_0(%arg0: i32) -> (i32, i32, i32) {
    %c0_i32 = arith.constant 0 : i32
    %c0_i32_0 = arith.constant 0 : i32
    %c0_i32_1 = arith.constant 0 : i32
    return %arg0, %c0_i32, %c0_i32_0 : i32, i32, i32
  }
  func.func @transform_1(%arg0: i32) -> (i32, i32, i32) {
    %c0_i32 = arith.constant 0 : i32
    %c0_i32_0 = arith.constant 0 : i32
    %c0_i32_1 = arith.constant 0 : i32
    return %arg0, %c0_i32, %c0_i32_0 : i32, i32, i32
  }
  func.func @transform_2(%arg0: i32) -> (i32, i32, i32) {
    %c0_i32 = arith.constant 0 : i32
    %c0_i32_0 = arith.constant 0 : i32
    %c0_i32_1 = arith.constant 0 : i32
    return %arg0, %c0_i32, %c0_i32_0 : i32, i32, i32
  }
  func.func @transform_3(%arg0: i32) -> (i32, i32) {
    %c0_i32 = arith.constant 0 : i32
    %c0_i32_0 = arith.constant 0 : i32
    %c0_i32_1 = arith.constant 0 : i32
    return %c0_i32, %c0_i32_0 : i32, i32
  }
  func.func @transform_4(%arg0: i32) -> (i32, i32) {
    %c0_i32 = arith.constant 0 : i32
    %c0_i32_0 = arith.constant 0 : i32
    %c0_i32_1 = arith.constant 0 : i32
    return %c0_i32, %c0_i32_0 : i32, i32
  }
  func.func @transform_5(%arg0: i32) -> (i32, i32) {
    %c0_i32 = arith.constant 0 : i32
    %c0_i32_0 = arith.constant 0 : i32
    %c0_i32_1 = arith.constant 0 : i32
    return %c0_i32, %c0_i32_0 : i32, i32
  }
  func.func @transform_6(%arg0: i32) -> (i32, i32) {
    %c0_i32 = arith.constant 0 : i32
    %c0_i32_0 = arith.constant 0 : i32
    %c0_i32_1 = arith.constant 0 : i32
    return %c0_i32, %c0_i32_0 : i32, i32
  }
  func.func @transform_7(%arg0: i32) -> (i32, i32) {
    %c0_i32 = arith.constant 0 : i32
    %c0_i32_0 = arith.constant 0 : i32
    %c0_i32_1 = arith.constant 0 : i32
    return %c0_i32, %c0_i32_0 : i32, i32
  }
  func.func @transform_8(%arg0: i32) -> (i32, i32) {
    %c0_i32 = arith.constant 0 : i32
    %c0_i32_0 = arith.constant 0 : i32
    %c0_i32_1 = arith.constant 0 : i32
    return %c0_i32, %c0_i32_0 : i32, i32
  }
  func.func @transform_9(%arg0: i32) -> (i32, i32) {
    %c0_i32 = arith.constant 0 : i32
    %c0_i32_0 = arith.constant 0 : i32
    %c0_i32_1 = arith.constant 0 : i32
    return %c0_i32, %c0_i32_0 : i32, i32
  }
  func.func @transform_10(%arg0: i32) -> (i32, i32) {
    %c0_i32 = arith.constant 0 : i32
    %c0_i32_0 = arith.constant 0 : i32
    %c0_i32_1 = arith.constant 0 : i32
    return %c0_i32, %c0_i32_0 : i32, i32
  }
  func.func @transform_11(%arg0: i32) -> (i32, i32) {
    %c0_i32 = arith.constant 0 : i32
    %c0_i32_0 = arith.constant 0 : i32
    %c0_i32_1 = arith.constant 0 : i32
    return %c0_i32, %c0_i32_0 : i32, i32
  }
  func.func @transform_12(%arg0: i32) -> (i32, i32) {
    %c0_i32 = arith.constant 0 : i32
    %c0_i32_0 = arith.constant 0 : i32
    %c0_i32_1 = arith.constant 0 : i32
    return %c0_i32, %c0_i32_0 : i32, i32
  }
  func.func @transform_13(%arg0: i32) -> (i32, i32) {
    %c0_i32 = arith.constant 0 : i32
    %c0_i32_0 = arith.constant 0 : i32
    %c0_i32_1 = arith.constant 0 : i32
    return %c0_i32, %c0_i32_0 : i32, i32
  }
  func.func @transform_14(%arg0: i32) -> (i32, i32) {
    %c0_i32 = arith.constant 0 : i32
    %c0_i32_0 = arith.constant 0 : i32
    %c0_i32_1 = arith.constant 0 : i32
    return %c0_i32, %c0_i32_0 : i32, i32
  }
  func.func @transform_15(%arg0: i32) -> (i32, i32) {
    %c0_i32 = arith.constant 0 : i32
    %c0_i32_0 = arith.constant 0 : i32
    %c0_i32_1 = arith.constant 0 : i32
    return %c0_i32, %c0_i32_0 : i32, i32
  }
  func.func @transform_16(%arg0: i32) -> (i32, i32) {
    %c0_i32 = arith.constant 0 : i32
    %c0_i32_0 = arith.constant 0 : i32
    %c0_i32_1 = arith.constant 0 : i32
    return %c0_i32, %c0_i32_0 : i32, i32
  }
  func.func @transform_17(%arg0: i32) -> (i32, i32) {
    %c0_i32 = arith.constant 0 : i32
    %c0_i32_0 = arith.constant 0 : i32
    %c0_i32_1 = arith.constant 0 : i32
    return %c0_i32, %c0_i32_0 : i32, i32
  }
  func.func @transform_18(%arg0: i32) -> (i32, i32, i32) {
    %c0_i32 = arith.constant 0 : i32
    %c0_i32_0 = arith.constant 0 : i32
    %c0_i32_1 = arith.constant 0 : i32
    return %arg0, %c0_i32, %c0_i32_0 : i32, i32, i32
  }
  func.func @transform_19(%arg0: i32) -> (i32, i32, i32) {
    %c0_i32 = arith.constant 0 : i32
    %c0_i32_0 = arith.constant 0 : i32
    %c0_i32_1 = arith.constant 0 : i32
    return %arg0, %c0_i32, %c0_i32_0 : i32, i32, i32
  }
  func.func @transform_20(%arg0: i32) -> (i32, i32, i32) {
    %c0_i32 = arith.constant 0 : i32
    %c0_i32_0 = arith.constant 0 : i32
    %c0_i32_1 = arith.constant 0 : i32
    return %arg0, %c0_i32, %c0_i32_0 : i32, i32, i32
  }
}

</mosaic_0001>

<bundles_post_ra>
// kernel: tpu_custom_call.1
= control target key start
LH: loop header
LB: loop body
LE: loop exit
PB: predicated region body
PF: predicated region fallthrough
CT: control target
= control target key end

     0   :  { %s2473_s0 = inlined_call_operand.vmem [shape: f32[2,1,8], index: 0, kind: input, shape index: {}]   ;;  %s2474_s1 = inlined_call_operand.vmem [shape: f32[2,1,1], index: 1, kind: input, shape index: {}]   ;;  %s2475_s2 = inlined_call_operand.hbm [shape: bf16[2,8,32], index: 2, kind: input, shape index: {}]   ;;  %s2476_s3 = inlined_call_operand.vmem [shape: bf16[1,32], index: 3, kind: input, shape index: {}]   ;;  %s2477_s4 = inlined_call_operand.vmem [shape: bf16[1,32], index: 4, kind: input, shape index: {}]   ;;  %s2478_s5 = inlined_call_operand.vmem [shape: bf16[32,32], index: 5, kind: input, shape index: {}]   ;;  %s2479_s6 = inlined_call_operand.vmem [shape: bf16[32,32], index: 6, kind: input, shape index: {}]   ;;  %s2480_s7 = inlined_call_operand.vmem [shape: bf16[32,32], index: 7, kind: input, shape index: {}]   ;;  %s2481_s8 = inlined_call_operand.vmem [shape: bf16[32,32], index: 8, kind: input, shape index: {}]   ;;  %s2482_s9 = inlined_call_operand.vmem [shape: bf16[1,32], index: 9, kind: input, shape index: {}]   ;;  %s2483_s10 = inlined_call_operand.vmem [shape: bf16[1,32], index: 10, kind: input, shape index: {}]   ;;  %s2484_s11 = inlined_call_operand.vmem [shape: bf16[32,128], index: 11, kind: input, shape index: {}]   ;;  %s2485_s12 = inlined_call_operand.vmem [shape: bf16[1,128], index: 12, kind: input, shape index: {}]   ;;  %s2486_s13 = inlined_call_operand.vmem [shape: bf16[128,32], index: 13, kind: input, shape index: {}]   ;;  %s2487_s14 = inlined_call_operand.vmem [shape: bf16[1,32], index: 14, kind: input, shape index: {}]   ;;  %s2488_s15 = inlined_call_operand.vmem [shape: bf16[1,32], index: 15, kind: input, shape index: {}]   ;;  %s2489_s16 = inlined_call_operand.vmem [shape: bf16[1,32], index: 16, kind: input, shape index: {}]   ;;  %s2490_s17 = inlined_call_operand.vmem [shape: bf16[1,32], index: 17, kind: input, shape index: {}]   ;;  %s2491_s18 = inlined_call_operand.hbm [shape: f32[2,1,8], index: 18, kind: output, shape index: {0}]   ;;  %s2492_s19 = inlined_call_operand.hbm [shape: f32[2,1,128], index: 19, kind: output, shape index: {1}]   ;;  %s2493_s20 = inlined_call_operand.hbm [shape: f32[2,1,128], index: 20, kind: output, shape index: {2}]  }
   0x1   :  { %2509 = sst [smem:[#allocation18_spill]] %s2473_s0 }
   0x2   :  { %2510 = sst [smem:[#allocation19_spill]] %s2474_s1 }
   0x3   :  { %2511 = sst [smem:[#allocation20_spill]] %s2475_s2 }
   0x4   :  { %2512 = sst [smem:[#allocation21_spill]] %s2476_s3 }
   0x5   :  { %2513 = sst [smem:[#allocation22_spill]] %s2477_s4 }
   0x6   :  { %2514 = sst [smem:[#allocation23_spill]] %s2478_s5 }
   0x7   :  { %2515 = sst [smem:[#allocation24_spill]] %s2479_s6 }
   0x8   :  { %2516 = sst [smem:[#allocation25_spill]] %s2480_s7 }
   0x9   :  { %2517 = sst [smem:[#allocation26_spill]] %s2481_s8 }
   0xa   :  { %2518 = sst [smem:[#allocation27_spill]] %s2491_s18 }
   0xb   :  { %2519 = sst [smem:[#allocation28_spill]] %s2492_s19 }
   0xc   :  { %2520 = sst [smem:[#allocation29_spill]] %s2493_s20 }
   0xd   :  { %26 = vsyncpa [#allocation3], 0 }
   0xe   :  { %28 = vsyncpa [#allocation3 + $0x1], 0 }
   0xf   :  { %29 = vsyncpa [#allocation4], 0 }
  0x10   :  { %31 = vsyncpa [#allocation4 + $0x1], 0 }
  0x11   :  { %32 = vsyncpa [#allocation7], 0 }
  0x12   :  { %34 = vsyncpa [#allocation7 + $0x1], 0  ;;  %s2084_s1 = smov 0   ;;  %s2086_s22 = smov 0  }
  0x13   :  { %s2088_s23 = smov 0   ;;  %s2090_s24 = smov 0  }
  0x14 LB: > { %2521 = sst [smem:[#allocation12_spill]] %s1958_s1  ;;  %s2105_s2 = sadd.s32 4294967295, %s1970_s24   ;;  %s1970_s24 = sphi %s2090_s24, %s2555_s24   ;;  %s1966_s23 = sphi %s2088_s23, %s2557_s23   ;;  %s1962_s22 = sphi %s2086_s22, %s2559_s22   ;;  %s1958_s1 = sphi %s2084_s1, %s2558_s1  }
  0x15   : > { %2522 = sst [smem:[#allocation13_spill]] %s1966_s23  ;;  %s2500_s25 = sadd.s32 4294967294, %s1970_s24  }
  0x16   : > { %s2109_s3 = sadd.s32 1, %s1970_s24   ;;  %s99_s26 = sadd.s32 1, %s1966_s23 }
  0x17   : > { %2523 = sst [smem:[#allocation14_spill]] %s2109_s3  ;;  %s96_s27 = ssub.s32 %s1970_s24, %s2109_s3 }
  0x18   : > { %p106_p0 = scmp.ne.s32.totalorder %s1966_s23, %s1962_s22  ;;  %p97_p1 = scmp.eq.s32.totalorder %s96_s27, 0 }
  0x19   : > { %p107_p2 = scmp.eq.s32.totalorder %s1970_s24, 0  ;;  %p112_p3 = scmp.ne.s32.totalorder %s1962_s22, %s1958_s1 }
  0x1a   : > { %p113_p4 = scmp.eq.s32.totalorder %s2105_s2, 0  ;;  %p451_p7 = scmp.eq.s32.totalorder %s2105_s2, 1 }
  0x1b   : > { %s2121_s28 = scalar_select %p97_p1, %s1966_s23, %s99_s26  }
  0x1c   : > { %p2123_p5 = por %p107_p2, %p106_p0  ;;  %p2127_p6 = por %p113_p4, %p112_p3 }
  0x1d   : > { %2524 = sst [smem:[#allocation15_spill]] %s2121_s28  ;;  %p457_p8 = scmp.eq.s32.totalorder %s2500_s25, 1 }
  0x1e   : > { %s2526_s29 = scalar_select %p2127_p6, 1, 0 }
  0x1f   : > { %p1747_p10 = scmp.lt.s32.totalorder %s1970_s24, 2  ;;  %p2136_p11 = por %p451_p7, %p106_p0 }
  0x20   : > { %p2140_p12 = por %p457_p8, %p112_p3  ;;  %s586_s21 = sand.u32 1, %s1966_s23  }
  0x21   : > { %s2527_s30 = scalar_select %p2136_p11, 1, 0 }
  0x22   : > { %s2529_s0 = scalar_select %p2140_p12, 1, 0 }
  0x23   : > { %2528 = sst [smem:[#allocation16_spill]] %s2527_s30  ;;  %s1588_s26 = sshll.u32 %s1970_s24, 6 }
  0x24   : > { %2530 = sst [smem:[#allocation17_spill]] %s2529_s0  ;;  %s1587_s27 = sshll.u32 %s586_s21, 2 }
  0x25   : > { %s2531_s1 = sld [smem:[#allocation20_spill]]  ;;  %s590_s25 = scalar_lea.vmem [#allocation2], %s1587_s27 }
  0x26   : > { %s597_s18 = sshll.u32 %s590_s25, 4  ;;  %p2153_p13 = pnand %p1747_p10, %p2123_p5  ;;  %s2157_s18 = int_to_ptr.vmem [resolvable:$true] %s597_s18 }
  0x27   : > { %s587_s23 = scalar_lea.sflag [#allocation3], %s586_s21 }
  0x28   : > { %p1824_p3 = pneg %p2153_p13 }
  0x2b   : > { %s2532_s20 = smov %s2531_s1  ;;  %s2149_s19 = scalar_lea.hbm %s2531_s1, %s1588_s26 }
  0x2c   : > { %s1822_s0 = scalar_lea.hbm %s2149_s19, 64  ;;  %s1827_s25 = scalar_lea.hbm %s2532_s20, 128 }
  0x2d   : > { %p1823_p2 = scmp.ne.s32.totalorder %s2149_s19, %s1822_s0  ;;  %p1828_p5 = scmp.lt.s32.totalorder %s2149_s19, %s2532_s20 }
  0x2e   : > { %p1829_p8 = scmp.lt.s32.totalorder %s1827_s25, %s1822_s0 }
  0x2f   : > { %p1825_p4 = pnand %p1824_p3, %p1823_p2 }
  0x30   : > { %p1830_p10 = por %p1829_p8, %p1828_p5 }
  0x31   : > { %p1826_p7 = pneg %p1825_p4 }
  0x33   : > { %p1831_p9 = pnand %p1830_p10, %p1826_p7 }
  0x35   : > { %1834 = shalt.err (!%p1831_p9)
}
  0x36   : > { %s1835_s21 = scalar_lea.vmem %s2157_s18, 64  ;;  %s1972_s26 = smov [#allocation2]  }
  0x37   : > { %p1836_p0 = scmp.ne.s32.totalorder %s2157_s18, %s1835_s21  ;;  %s1840_s27 = sshll.u32 %s1972_s26, 4  ;;  %s1841_s27 = int_to_ptr.vmem [resolvable:$false] %s1840_s27 }
  0x38   : > { %s1842_s1 = scalar_lea.vmem %s1841_s27, 128  ;;  %p1843_p4 = scmp.lt.s32.totalorder %s2157_s18, %s1841_s27 }
  0x39   : > { %p1838_p1 = pnand %p1836_p0, %p1824_p3  ;;  %p1844_p12 = scmp.lt.s32.totalorder %s1842_s1, %s1835_s21 }
  0x3b   : > { %p1839_p2 = pneg %p1838_p1  ;;  %p1845_p11 = por %p1844_p12, %p1843_p4 }
  0x3d   : > { %p1846_p6 = pnand %p1845_p11, %p1839_p2 }
  0x3f   : > { %1849 = shalt.err (!%p1846_p6)
}
  0x40   : > { %1736 = dma.hbm_to_vmem [thread:$0]  (!%p2153_p13), %s2149_s19, 64, %s2157_s18, %s587_s23  }
  0x41   : > { %p2534_p9 = scmp.lt.s32.totalorder %s1970_s24, 3  ;;  %p2535_p7 = scmp.ge.s32.totalorder %s1970_s24, 1 }
  0x43   : > { %p603_p0 = pnand %p2535_p7, %p2534_p9 }
  0x44   : > { %s2184_s0 = sand.u32 (!%p603_p0), 1, %s1962_s22   ;;  %p2536_p6 = scmp.ne.s32.totalorder (!%p603_p0), %s2526_s29, 0 }
  0x45   : > { %606 = sbr.rel (%p603_p0) target bundleno = 2940 (0xb7c), region = 92  ;;  %s1590_s3 = sshll.u32 (!%p603_p0), %s2184_s0, 2 }
  0x46   : > { %s609_s25 = scalar_lea.sflag (!%p603_p0), [#allocation3], %s2184_s0  ;;  %s612_s28 = scalar_lea.vmem (!%p603_p0), [#allocation2], %s1590_s3 }
  0x4a   : > { %1945 = dma.done.wait (%p2536_p6), %s609_s25, 64  }
  0x4b   : > { %1947 = vsyncadd (%p2536_p6), %s609_s25, 4294967232  ;;  %vm691_vm0 = vcmask 261120   ;;  %v689_v0 = vld [vmem:[%s612_s28] sm:$0xf]  ;;  %s2537_s5 = sld [smem:[#allocation23_spill]]  ;;  %v1973_v9 = vmov 0.0   ;;  %v708_v14 = vlaneseq }
  0x4c   : > { %v2192_v1 = vunpack.c.l.bf16 %v689_v0  ;;  %1649 = vmatprep.subr.bf16.mxu0 %v1973_v9  ;;  %vm1974_vm1 = vmmov 0   ;;  %1673 = vmatprep.subr.bf16.mxu1 %v1973_v9  ;;  %s2538_s21 = sld [smem:[#allocation21_spill]]  ;;  %vm967_vm2 = vcmask 1043456   ;;  %vm947_vm4 = vcmask 64512   ;;  %p682_p11 = scmp.lt.s32.totalorder %s2105_s2, 1 }
  0x4d   : > { %1653 = vmatprep.mubr.msk.bf16.mxu0 %vm1974_vm1, %v1973_v9  ;;  %1675 = vmatprep.mubr.msk.bf16.mxu1 %vm1974_vm1, %v1973_v9  ;;  %v2212_v15 = vshrl.u32 %v708_v14, 7  ;;  %s2539_s1 = sld [smem:[#allocation22_spill]]  ;;  %v2256_v49 = vand.u32 127, %v708_v14  ;;  %vm1333_vm5 = vcmask 57344   ;;  %s1401_s27 = scalar_lea.sflag [#allocation4], %s2184_s0 }
  0x4e   : > { %v692_v2 = vsel %vm691_vm0, %v2192_v1, 0.0  ;;  %s2540_s6 = sld [smem:[#allocation24_spill]]  ;;  %s1976_s3 = smov [#allocation5]  }
  0x4f   : > { %693 = vadd.xlane.f32.xlu0 %v692_v2  ;;  %v2221_v19 = vsub.s32 0, %v2212_v15  ;;  %s2541_s7 = sld [smem:[#allocation25_spill]]  ;;  %vm945_vm3 = vcmp.ge.s32.totalorder %v2212_v15, %v2256_v49 }
  0x50   : > { %s2542_s8 = sld [smem:[#allocation26_spill]] }
  0x51   : > { %v1786_v8 = vld [vmem:[%s2537_s5 + $0x8] sm:$0xff]   ;;  %v1787_v10 = vld [vmem:[%s2537_s5] sm:$0xff]   ;;  %s683_s25 = scalar_select %p682_p11, %s2105_s2, 1 }
  0x52   : > { %1650 = vmatpush3.bf16.msra.mxu0 %v1786_v8  ;;  %v706_v16 = vld [vmem:[%s2538_s21] sm:$0x1]  ;;  %s2543_s19 = sld [smem:[#allocation19_spill]] }
  0x53   : > { %1651 = vmatprep.subr.bf16.mxu0 %v1973_v9  ;;  %v713_v17 = vld [vmem:[%s2539_s1] sm:$0x1]  ;;  %v707_v18 = vunpack.c.l.bf16 %v706_v16  ;;  %s2544_s28 = sld [smem:[#allocation18_spill]] }
  0x54   : > { %v714_v20 = vunpack.c.l.bf16 %v713_v17  ;;  %v1788_v27 = vld [vmem:[%s2540_s6 + $0x8] sm:$0xff]   ;;  %v1789_v29 = vld [vmem:[%s2540_s6] sm:$0xff]   ;;  %s2546_s4 = sld [smem:[#allocation27_spill]] }
  0x55   : > { %v711_v21 = vrot.slane %v707_v18, %v2221_v19  ;;  %v1790_v30 = vld [vmem:[%s2541_s7 + $0x8] sm:$0xff]   ;;  %v1791_v31 = vld [vmem:[%s2541_s7] sm:$0xff]  }
  0x56   : > { %1652 = vmatpush3.bf16.msra.mxu0 %v1787_v10  ;;  %v718_v24 = vrot.slane %v714_v20, %v2221_v19  ;;  %v1792_v63 = vld [vmem:[%s2542_s8 + $0x8] sm:$0xff]   ;;  %v1793_v0 = vld [vmem:[%s2542_s8] sm:$0xff]  }
  0x57   : > { %1657 = vmatprep.subr.bf16.mxu0 %v1973_v9 }
  0x58   : > { %s687_s23 = scalar_lea.vmem %s2543_s19, %s683_s25  ;;  %s669_s19 = scalar_lea.vmem [#allocation5], %s2184_s0 }
  0x59   : > { %s684_s18 = scalar_lea.vmem %s2544_s28, %s683_s25  ;;  %s2545_s25 = sld [smem:[#allocation16_spill]] }
  0x5a   : > { %s1421_s26 = sshll.u32 %s669_s19, 4  ;;  %s1854_s28 = sshll.u32 %s1976_s3, 4  ;;  %s1422_s26 = int_to_ptr.vmem [resolvable:$true] %s1421_s26  ;;  %s1855_s28 = int_to_ptr.vmem [resolvable:$false] %s1854_s28 }
  0x5b   : > { %s1850_s1 = scalar_lea.vmem %s1422_s26, 16  ;;  %p1857_p5 = scmp.lt.s32.totalorder %s1422_s26, %s1855_s28 }
  0x5c   : > { %p1851_p12 = scmp.ne.s32.totalorder %s1422_s26, %s1850_s1 }
  0x5f   : > { %p2547_p13 = scmp.ne.s32.totalorder %s2545_s25, 0 }
  0x61   : > { %p1852_p1 = pnand %p1851_p12, %p2547_p13 }
  0x63   : > { %p1853_p3 = pneg %p1852_p1 }
  0xd8   : > { %v694_v3 = vpop.xlane.xlu0 %693 }
  0xd9   : > { %v696_v4 = vmul.f32 0.03125, %v694_v3 }
  0xdb   : > { %v697_v5 = vsub.f32 %v2192_v1, %v696_v4 }
  0xdd   : > { %v698_v6 = vmul.f32 %v697_v5, %v697_v5 }
  0xdf   : > { %v699_v7 = vsel %vm691_vm0, %v698_v6, 0.0 }
  0xe0   : > { %700 = vadd.xlane.f32.xlu0 %v699_v7 }
 0x169   : > { %v701_v11 = vpop.xlane.xlu0 %700 }
 0x16a   : > { %v702_v12 = vmul.f32 0.03125, %v701_v11 }
 0x16c   : > { %v703_v13 = vadd.f32 1e-05, %v702_v12 }
 0x16e   : > { %1804 = vrsqrt.f32 %v703_v13 }
 0x17b   : > { %v1805_v22 = vpop.eup %1804 }
 0x17c   : > { %v705_v23 = vmul.f32 %v1805_v22, %v697_v5 }
 0x17e   : > { %v712_v25 = vmul.f32 %v711_v21, %v705_v23 }
 0x180   : > { %v719_v26 = vadd.f32 %v718_v24, %v712_v25 }
 0x182   : > { %v720_v28 = vpack.c.bf16 %v719_v26, %v719_v26 }
 0x184   : > { %1654 = vmatmul.mubr.msk.bf16.vlgmr.msra.gmra.mxu0 %vm691_vm0, %v720_v28 }
 0x185   : > { %1658 = vmatpush3.bf16.msra.mxu0 %v1788_v27  ;;  %1661 = vmatprep.mubr.msk.bf16.mxu0 %vm1974_vm1, %v1973_v9 }
 0x186   : > { %1659 = vmatprep.subr.bf16.mxu0 %v1973_v9 }
 0x189   : > { %1660 = vmatpush3.bf16.msra.mxu0 %v1789_v29 }
 0x18a   : > { %1665 = vmatprep.subr.bf16.mxu0 %v1973_v9 }
 0x18c   : > { %1662 = vmatmul.mubr.msk.bf16.vlgmr.msra.gmra.mxu0 %vm691_vm0, %v720_v28 }
 0x18d   : > { %1666 = vmatpush3.bf16.msra.mxu0 %v1790_v30  ;;  %1669 = vmatprep.mubr.msk.bf16.mxu0 %vm1974_vm1, %v1973_v9  ;;  %v1795_v30 = vld [vmem:[%s2484_s11] sm:$0xff]  }
 0x18e   : > { %1667 = vmatprep.subr.bf16.mxu0 %v1973_v9 }
 0x191   : > { %1668 = vmatpush3.bf16.msra.mxu0 %v1791_v31 }
 0x192   : > { %1679 = vmatprep.subr.bf16.mxu0 %v1973_v9 }
 0x194   : > { %1670 = vmatmul.mubr.msk.bf16.vlgmr.msra.gmra.mxu0 %vm691_vm0, %v720_v28 }
 0x195   : > { %1681 = vmatprep.mubr.msk.bf16.mxu0 %vm1974_vm1, %v1973_v9 }
 0x244   : > { %v774_v32 = vpop.f32.mrf.mxu0 }
 0x245   : > { %v780_v43 = vpack.c.bf16 %v774_v32, %v774_v32 }
 0x246   : > { %v1655_v33 = vpop.f32.mrf.mxu0 }
 0x248   : > { %v777_v34 = vpop.f32.mrf.mxu0 }
 0x249   : > { %v1088_v34 = vld [vmem:[%s2482_s9] sm:$0x1] }
 0x24a   : > { %v1656_v35 = vpop.f32.mrf.mxu0 }
 0x24b   : > { %v1095_v35 = vld [vmem:[%s2483_s10] sm:$0x1] }
 0x24c   : > { %v831_v36 = vpop.f32.mrf.mxu0 }
 0x24d   : > { %v837_v37 = vpack.c.bf16 %v831_v36, %v831_v36  ;;  %v1089_v36 = vunpack.c.l.bf16 %v1088_v34 }
 0x24e   : > { %v1663_v38 = vpop.f32.mrf.mxu0 }
 0x24f   : > { %v903_v39 = vsel %vm691_vm0, %v837_v37, 0  ;;  %v1096_v37 = vunpack.c.l.bf16 %v1095_v35  ;;  %v1093_v38 = vrot.slane %v1089_v36, %v2221_v19 }
 0x250   : > { %v834_v40 = vpop.f32.mrf.mxu0  ;;  %1674 = vmatpush3.bf16.xpose.msra.mxu1 %v903_v39 }
 0x251   : > { %1685 = vmatprep.subr.bf16.mxu1 %v1973_v9 }
 0x252   : > { %v1664_v41 = vpop.f32.mrf.mxu0 }
 0x253   : > { %v1100_v41 = vrot.slane %v1096_v37, %v2221_v19 }
 0x254   : > { %v888_v42 = vpop.f32.mrf.mxu0 }
 0x255   : > { %v894_v44 = vpack.c.bf16 %v888_v42, %v888_v42 }
 0x256   : > { %v1671_v45 = vpop.f32.mrf.mxu0 }
 0x257   : > { %v969_v46 = vsel %vm967_vm2, %v894_v44, 0  ;;  %1676 = vmatmul.mubr.msk.bf16.vlgmr.msra.gmra.mxu1 %vm691_vm0, %v780_v43  ;;  %v1796_v45 = vld [vmem:[%s2486_s13 + $0x38] sm:$0xff]  }
 0x258   : > { %v891_v47 = vpop.f32.mrf.mxu0  ;;  %1680 = vmatpush3.bf16.msra.mxu0 %v969_v46  ;;  %1689 = vmatprep.mubr.msk.bf16.mxu1 %vm1974_vm1, %v1973_v9  ;;  %v1797_v46 = vld [vmem:[%s2486_s13 + $0x30] sm:$0xff]  }
 0x259   : > { %1693 = vmatprep.subr.bf16.mxu0 %v1973_v9  ;;  %1686 = vmatpush3.bf16.msra.mxu1 %v1792_v63  ;;  %v1798_v47 = vld [vmem:[%s2486_s13 + $0x28] sm:$0xff]  }
 0x25a   : > { %v1672_v48 = vpop.f32.mrf.mxu0  ;;  %1687 = vmatprep.subr.bf16.mxu1 %v1973_v9 }
 0x25b   : > { %v1799_v48 = vld [vmem:[%s2486_s13 + $0x20] sm:$0xff]  }
 0x25d   : > { %1688 = vmatpush3.bf16.msra.mxu1 %v1793_v0 }
 0x25e   : > { %1701 = vmatprep.subr.bf16.mxu1 %v1973_v9 }
 0x317   : > { %v939_v50 = vpop.f32.mrf.mxu1 }
 0x318   : > { %v946_v51 = vsel %vm945_vm3, %v939_v50, -1e+30  ;;  %v1800_v50 = vld [vmem:[%s2486_s13 + $0x18] sm:$0xff]  }
 0x319   : > { %v1677_v52 = vpop.f32.mrf.mxu1  ;;  %v948_v53 = vsel %vm947_vm4, %v946_v51, -inf }
 0x31a   : > { %949 = vmax.xlane.f32.xlu1 %v948_v53  ;;  %v1802_v52 = vld [vmem:[%s2486_s13 + $0x8] sm:$0xff]   ;;  %v1803_v53 = vld [vmem:[%s2486_s13] sm:$0xff]  }
 0x31b   : > { %v942_v54 = vpop.f32.mrf.mxu1 }
 0x31c   : > { %v1107_v54 = vld [vmem:[%s2485_s12] sm:$0x1] }
 0x31d   : > { %v1678_v55 = vpop.f32.mrf.mxu1 }
 0x31e   : > { %v1108_v55 = vunpack.c.l.bf16 %v1107_v54 }
 0x3a3   : > { %v950_v56 = vpop.xlane.xlu1 %949 }
 0x3a4   : > { %v951_v57 = vmax.f32 %v950_v56, -1e+30  ;;  %v1112_v56 = vrot.slane %v1108_v55, %v2221_v19 }
 0x3a6   : > { %v955_v58 = vsub.f32 %v946_v51, %v951_v57  ;;  %v952_v2 = vsub.f32 -1e+30, %v951_v57  ;;  %v1801_v51 = vld [vmem:[%s2486_s13 + $0x10] sm:$0xff]  }
 0x3a8   : > { %v956_v59 = vmul.f32 1.442695, %v955_v58  ;;  %v953_v3 = vmul.f32 1.442695, %v952_v2 }
 0x3aa   : > { %1806 = vpow2.f32 %v956_v59 }
 0x3ab   : > { %1808 = vpow2.f32 %v953_v3 }
 0x3b7   : > { %v1807_v60 = vpop.eup %1806 }
 0x3b8   : > { %v959_v61 = vsel %vm947_vm4, %v1807_v60, 0.0  ;;  %v963_v62 = vpack.c.bf16 %v1807_v60, %v1807_v60  ;;  %v1809_v4 = vpop.eup %1808 }
 0x3b9   : > { %960 = vadd.xlane.f32.xlu1 %v959_v61  ;;  %v958_v6 = vmul.f32 0.0, %v1809_v4 }
 0x3ba   : > { %1682 = vmatmul.mubr.msk.bf16.vlgmr.msra.gmra.mxu0 %vm947_vm4, %v963_v62 }
 0x3bb   : > { %1697 = vmatprep.mubr.msk.bf16.mxu0 %vm1974_vm1, %v1973_v9 }
 0x442   : > { %v961_v5 = vpop.xlane.xlu1 %960 }
 0x443   : > { %v962_v7 = vadd.f32 %v961_v5, %v958_v6 }
 0x445   : > { %1810 = vrcp.f32 %v962_v7 }
 0x452   : > { %v1811_v11 = vpop.eup %1810 }
 0x47a   : > { %v1005_v8 = vpop.f32.mrf.mxu0 }
 0x47b   : > { %v1011_v10 = vadd.f32 %v1005_v8, %v958_v6  ;;  %v1283_v8 = vld [vmem:[%s2487_s14] sm:$0x1] }
 0x47c   : > { %v1683_v12 = vpop.f32.mrf.mxu0 }
 0x47d   : > { %v1013_v13 = vmul.f32 %v1811_v11, %v1011_v10  ;;  %v1284_v10 = vunpack.c.l.bf16 %v1283_v8 }
 0x47e   : > { %v1008_v14 = vpop.f32.mrf.mxu0 }
 0x47f   : > { %v1014_v16 = vpack.c.bf16 %v1013_v13, %v1013_v13  ;;  %v1288_v11 = vrot.slane %v1284_v10, %v2221_v19 }
 0x480   : > { %v1684_v17 = vpop.f32.mrf.mxu0 }
 0x481   : > { %1690 = vmatmul.mubr.msk.bf16.vlgmr.msra.gmra.mxu1 %vm691_vm0, %v1014_v16 }
 0x482   : > { %1717 = vmatprep.mubr.msk.bf16.mxu1 %vm1974_vm1, %v1973_v9  ;;  %1702 = vmatpush3.bf16.msra.mxu1 %v1796_v45  ;;  %v1335_v45 = vld [vmem:[%s684_s18] sm:$0x1]  ;;  %s1856_s18 = scalar_lea.vmem %s1855_s28, 32 }
 0x483   : > { %1703 = vmatprep.subr.bf16.mxu1 %v1973_v9  ;;  %p1858_p8 = scmp.lt.s32.totalorder %s1856_s18, %s1850_s1 }
 0x485   : > { %p1859_p10 = por %p1858_p8, %p1857_p5 }
 0x486   : > { %1704 = vmatpush3.bf16.msra.mxu1 %v1797_v46  ;;  %v1361_v46 = vrot.slane %v1335_v45, %v2221_v19 }
 0x487   : > { %1705 = vmatprep.subr.bf16.mxu1 %v1973_v9  ;;  %p1860_p2 = pnand %p1859_p10, %p1853_p3 }
 0x48a   : > { %1706 = vmatpush3.bf16.msra.mxu1 %v1798_v47  ;;  %v1388_v47 = vsel %vm1333_vm5, %v1335_v45, 0.0 }
 0x48b   : > { %1707 = vmatprep.subr.bf16.mxu1 %v1973_v9 }
 0x48e   : > { %1708 = vmatpush3.bf16.msra.mxu1 %v1799_v48  ;;  %v1330_v48 = vsub.s32 %v2256_v49, %v2212_v15 }
 0x48f   : > { %1709 = vmatprep.subr.bf16.mxu1 %v1973_v9 }
 0x492   : > { %1710 = vmatpush3.bf16.msra.mxu1 %v1800_v50 }
 0x493   : > { %1711 = vmatprep.subr.bf16.mxu1 %v1973_v9 }
 0x496   : > { %1712 = vmatpush3.bf16.msra.mxu1 %v1801_v51 }
 0x497   : > { %1713 = vmatprep.subr.bf16.mxu1 %v1973_v9 }
 0x49a   : > { %1714 = vmatpush3.bf16.msra.mxu1 %v1802_v52 }
 0x49b   : > { %1715 = vmatprep.subr.bf16.mxu1 %v1973_v9 }
 0x49e   : > { %1716 = vmatpush3.bf16.msra.mxu1 %v1803_v53 }
 0x541   : > { %v1068_v18 = vpop.f32.mrf.mxu1 }
 0x542   : > { %v2277_v20 = vadd.f32 %v1068_v18, %v2192_v1  ;;  %v1794_v1 = vld [vmem:[%s2484_s11 + $0x8] sm:$0xff]  }
 0x543   : > { %v1691_v21 = vpop.f32.mrf.mxu1  ;;  %1694 = vmatpush3.bf16.msra.mxu0 %v1794_v1 }
 0x544   : > { %v1075_v22 = vsel %vm691_vm0, %v2277_v20, 0.0  ;;  %1695 = vmatprep.subr.bf16.mxu0 %v1973_v9 }
 0x545   : > { %1076 = vadd.xlane.f32.xlu0 %v1075_v22  ;;  %v1071_v23 = vpop.f32.mrf.mxu1 }
 0x547   : > { %v1692_v24 = vpop.f32.mrf.mxu1  ;;  %1696 = vmatpush3.bf16.msra.mxu0 %v1795_v30  ;;  %v1303_v30 = vld [vmem:[%s2488_s15] sm:$0x1] }
 0x5ce   : > { %v1077_v25 = vpop.xlane.xlu0 %1076 }
 0x5cf   : > { %v1078_v26 = vmul.f32 0.03125, %v1077_v25 }
 0x5d1   : > { %v1079_v27 = vsub.f32 %v2277_v20, %v1078_v26 }
 0x5d3   : > { %v1080_v28 = vmul.f32 %v1079_v27, %v1079_v27 }
 0x5d5   : > { %v1081_v29 = vsel %vm691_vm0, %v1080_v28, 0.0 }
 0x5d6   : > { %1082 = vadd.xlane.f32.xlu1 %v1081_v29 }
 0x65f   : > { %v1083_v31 = vpop.xlane.xlu1 %1082 }
 0x660   : > { %v1084_v32 = vmul.f32 0.03125, %v1083_v31  ;;  %v1310_v31 = vld [vmem:[%s2489_s16] sm:$0x1] }
 0x661   : > { %v1311_v34 = vunpack.c.l.bf16 %v1310_v31 }
 0x662   : > { %v1085_v33 = vadd.f32 1e-05, %v1084_v32  ;;  %v1304_v32 = vunpack.c.l.bf16 %v1303_v30 }
 0x664   : > { %1812 = vrsqrt.f32 %v1085_v33  ;;  %v1317_v33 = vld [vmem:[%s2490_s17] sm:$0x1]  ;;  %v1308_v35 = vrot.slane %v1304_v32, %v2221_v19 }
 0x665   : > { %v1318_v36 = vunpack.c.l.bf16 %v1317_v33 }
 0x671   : > { %v1813_v39 = vpop.eup %1812 }
 0x672   : > { %v1087_v40 = vmul.f32 %v1813_v39, %v1079_v27  ;;  %v1975_v27 = vmov 0   ;;  %v1315_v39 = vrot.slane %v1311_v34, %v2221_v19 }
 0x673   : > { %1784 = vset.pattern.permute.xlu1 %v1975_v27  ;;  %1785 = vset.pattern.permute.xlu0 %v1975_v27 }
 0x674   : > { %v1094_v42 = vmul.f32 %v1093_v38, %v1087_v40 }
 0x676   : > { %v1101_v43 = vadd.f32 %v1100_v41, %v1094_v42  ;;  %v1322_v41 = vrot.slane %v1318_v36, %v2221_v19 }
 0x678   : > { %v1102_v44 = vpack.c.bf16 %v1101_v43, %v1101_v43 }
 0x67a   : > { %1698 = vmatmul.mubr.msk.bf16.vlgmr.msra.gmra.mxu0 %vm691_vm0, %v1102_v44 }
 0x73a   : > { %v1162_v57 = vpop.f32.mrf.mxu0 }
 0x73b   : > { %v1163_v58 = vadd.f32 %v1162_v57, %v1112_v56 }
 0x73c   : > { %v1699_v59 = vpop.f32.mrf.mxu0 }
 0x73d   : > { %v1168_v60 = vmul.f32 %v1163_v58, %v1163_v58 }
 0x73e   : > { %v1165_v61 = vpop.f32.mrf.mxu0 }
 0x73f   : > { %v1169_v62 = vmul.f32 %v1168_v60, %v1163_v58 }
 0x740   : > { %v1700_v63 = vpop.f32.mrf.mxu0 }
 0x741   : > { %v1170_v0 = vmul.f32 0.044715, %v1169_v62 }
 0x743   : > { %v1171_v2 = vadd.f32 %v1170_v0, %v1163_v58 }
 0x745   : > { %v1172_v3 = vmul.f32 0.7978846, %v1171_v2 }
 0x747   : > { %1814 = vtanh.f32 %v1172_v3 }
 0x754   : > { %v1815_v9 = vpop.eup %1814 }
 0x755   : > { %v1174_v4 = vadd.f32 1.0, %v1815_v9 }
 0x757   : > { %v1175_v5 = vmul.f32 0.5, %v1174_v4 }
 0x759   : > { %v1176_v6 = vmul.f32 %v1175_v5, %v1163_v58 }
 0x75b   : > { %v1177_v7 = vpack.c.bf16 %v1176_v6, %v1176_v6 }
 0x75d   : > { %1718 = vmatmul.mubr.bf16.vlgmr.msra.gmra.mxu1 %v1177_v7 }
 0x81d   : > { %v1276_v12 = vpop.f32.mrf.mxu1 }
 0x81e   : > { %v1282_v13 = vadd.f32 %v1276_v12, %v2277_v20  ;;  %v1336_v20 = vld [vmem:[%s687_s23] sm:$0x1]  ;;  %s2371_s23 = sshll.u32 %s2105_s2, 4 }
 0x81f   : > { %v1719_v14 = vpop.f32.mrf.mxu1  ;;  %s1419_s21 = scalar_lea.hbm %s2546_s4, %s2371_s23 }
 0x820   : > { %v1289_v16 = vadd.f32 %v1288_v11, %v1282_v13 }
 0x821   : > { %v1279_v17 = vpop.f32.mrf.mxu1 }
 0x822   : > { %v1290_v18 = vsel %vm691_vm0, %v1289_v16, 0.0 }
 0x823   : > { %1291 = vadd.xlane.f32.xlu0 %v1290_v18  ;;  %v1720_v21 = vpop.f32.mrf.mxu1 }
 0x8ac   : > { %v1292_v22 = vpop.xlane.xlu0 %1291 }
 0x8ad   : > { %v1293_v23 = vmul.f32 0.03125, %v1292_v22 }
 0x8af   : > { %v1294_v24 = vsub.f32 %v1289_v16, %v1293_v23 }
 0x8b1   : > { %v1295_v25 = vmul.f32 %v1294_v24, %v1294_v24 }
 0x8b3   : > { %v1296_v26 = vsel %vm691_vm0, %v1295_v25, 0.0 }
 0x8b4   : > { %1297 = vadd.xlane.f32.xlu1 %v1296_v26 }
 0x8c5   : > { %1340 = vperm.xlu1 %1784, %v1336_v20  }
 0x93d   : > { %v1298_v28 = vpop.xlane.xlu1 %1297 }
 0x93e   : > { %v1299_v29 = vmul.f32 0.03125, %v1298_v28 }
 0x940   : > { %v1300_v1 = vadd.f32 1e-05, %v1299_v29 }
 0x941   : > { %v1341_v57 = vpop.permute.xlu1 %1340 }
 0x942   : > { %1816 = vrsqrt.f32 %v1300_v1  ;;  %v1346_v58 = vrot.slane %v1341_v57, %v2221_v19 }
 0x94f   : > { %v1817_v37 = vpop.eup %1816 }
 0x950   : > { %v1302_v38 = vmul.f32 %v1817_v37, %v1294_v24 }
 0x952   : > { %v1309_v40 = vmul.f32 %v1308_v35, %v1302_v38 }
 0x954   : > { %v1316_v42 = vadd.f32 %v1315_v39, %v1309_v40 }
 0x956   : > { %v1323_v43 = vmul.f32 %v1322_v41, %v1316_v42 }
 0x958   : > { %v1324_v44 = vsel %vm691_vm0, %v1323_v43, 0.0 }
 0x959   : > { %1325 = vadd.xlane.f32.xlu0 %v1324_v44 }
 0x96f   : > { %1363 = vbcast.lane.b32.xlu0 %v1361_v46, 256 }
 0x98e   : > { %1389 = vadd.xlane.f32.xlu0 %v1388_v47 }
 0x9e2   : > { %v1326_v50 = vpop.xlane.xlu0 %1325 }
 0x9e3   : > { %v1349_v51 = vand.u32 2147483647, %v1326_v50  ;;  %v1331_v52 = vrot.slane %v1326_v50, %v1330_v48  ;;  %v1337_v59 = vmax.f32 %v1326_v50, 0.0  ;;  %v1347_v60 = vmul.f32 %v1346_v58, %v1326_v50 }
 0x9e5   : > { %v1350_v53 = vsub.f32 0.0, %v1349_v51  ;;  %1334 = vst.msk [vmem:[%s669_s19] sm:$0x1] %vm1333_vm5, %v1331_v52  ;;  %v1348_v61 = vsub.f32 %v1337_v59, %v1347_v60 }
 0x9e6   : > { %v1364_v62 = vpop.permute.xlu0 %1363 }
 0x9e7   : > { %v1351_v54 = vmul.f32 1.442695, %v1350_v53 }
 0x9e9   : > { %1818 = vpow2.f32 %v1351_v54 }
 0x9f6   : > { %v1819_v55 = vpop.eup %1818 }
 0x9f7   : > { %v1353_v56 = vadd.f32 1.0, %v1819_v55 }
 0x9f9   : > { %1820 = vlog2.f32 %v1353_v56 }
 0xa06   : > { %v1821_v15 = vpop.eup %1820 }
 0xa07   : > { %v1355_v49 = vmul.f32 0.6931472, %v1821_v15 }
 0xa09   : > { %v1356_v63 = vadd.f32 %v1355_v49, %v1348_v61 }
 0xa0b   : > { %v1366_v0 = vmul.f32 %v1364_v62, %v1356_v63 }
 0xa0d   : > { %1369 = vperm.xlu1 %1784, %v1366_v0  }
 0xa88   : > { %v1370_v2 = vpop.permute.xlu1 %1369 }
 0xa89   : > { %v1374_v3 = vrot.slane %v1370_v2, %v1330_v48 }
 0xa8b   : > { %v1376_v9 = vsel %vm1333_vm5, %v1374_v3, 0.0 }
 0xa8c   : > { %1377 = vadd.xlane.f32.xlu1 %v1376_v9 }
 0xa8d   : > { %1863 = shalt.err (!%p1860_p2)
}
 0xa8e   : > { %s1864_s5 = scalar_lea.hbm %s1419_s21, 16  ;;  %s1868_s30 = scalar_lea.hbm %s2546_s4, 32 }
 0xa8f   : > { %p1865_p4 = scmp.ne.s32.totalorder %s1419_s21, %s1864_s5  ;;  %p1869_p0 = scmp.lt.s32.totalorder %s1419_s21, %s2546_s4 }
 0xa90   : > { %p1870_p6 = scmp.lt.s32.totalorder %s1868_s30, %s1864_s5 }
 0xa91   : > { %p1866_p9 = pnand %p1865_p4, %p2547_p13 }
 0xa92   : > { %p1871_p11 = por %p1870_p6, %p1869_p0 }
 0xa93   : > { %p1867_p7 = pneg %p1866_p9 }
 0xa95   : > { %p1872_p12 = pnand %p1871_p11, %p1867_p7 }
 0xa97   : > { %1875 = shalt.err (!%p1872_p12)
}
 0xa98   : > { %1727 = dma.vmem_to_hbm [thread:$0]  (%p2547_p13), %s1422_s26, 16, %s1419_s21, %s1401_s27   ;;  %v1390_v19 = vpop.xlane.xlu0 %1389 }
 0xa99   : > { %v1391_v4 = vrot.slane %v1390_v19, 4  ;;  %s1404_s5 = sand.u32 1, %s2105_s2   ;;  %s681_s6 = scalar_lea.vmem [#allocation8], %s2184_s0 }
 0xa9a   : > { %s1447_s7 = sshll.u32 %s681_s6, 4  ;;  %s675_s21 = scalar_lea.vmem [#allocation6], %s2184_s0  ;;  %s2393_s7 = int_to_ptr.vmem [resolvable:$true] %s1447_s7 }
 0xa9b   : > { %v1392_v5 = vadd.f32 %v1391_v4, %v1390_v19  ;;  %s1434_s26 = sshll.u32 %s675_s21, 4  ;;  %s2548_s3 = sld [smem:[#allocation28_spill]]  ;;  %s2401_s26 = int_to_ptr.vmem [resolvable:$true] %s1434_s26 }
 0xa9c   : > { %s2549_s30 = sld [smem:[#allocation29_spill]]  ;;  %s2409_s4 = scalar_lea.sflag [#allocation7], %s1404_s5 }
 0xa9d   : > { %v1393_v6 = vrot.slane %v1392_v5, 2  ;;  %s1876_s27 = scalar_lea.vmem %s2401_s26, 16  ;;  %s1977_s1 = smov [#allocation6]  }
 0xa9e   : > { %p1877_p1 = scmp.ne.s32.totalorder %s2401_s26, %s1876_s27  ;;  %s1880_s8 = sshll.u32 %s1977_s1, 4  ;;  %s1881_s8 = int_to_ptr.vmem [resolvable:$false] %s1880_s8 }
 0xa9f   : > { %v1394_v11 = vadd.f32 %v1393_v6, %v1392_v5  ;;  %p1883_p8 = scmp.lt.s32.totalorder %s2401_s26, %s1881_s8 }
 0xaa0   : > { %p1878_p3 = pnand %p1877_p1, %p2547_p13 }
 0xaa1   : > { %v1395_v14 = vrot.slane %v1394_v11, 1  ;;  %s2399_s28 = scalar_lea.hbm %s2548_s3, %s2371_s23 }
 0xaa2   : > { %s2407_s0 = scalar_lea.hbm %s2549_s30, %s2371_s23  ;;  %p1879_p5 = pneg %p1878_p3 }
 0xaa3   : > { %v1396_v18 = vadd.f32 %v1395_v14, %v1394_v11 }
 0xb15   : > { %v1378_v7 = vpop.xlane.xlu1 %1377 }
 0xb16   : > { %v1379_v8 = vrot.slane %v1378_v7, 4 }
 0xb18   : > { %v1380_v10 = vadd.f32 %v1379_v8, %v1378_v7 }
 0xb1a   : > { %v1381_v12 = vrot.slane %v1380_v10, 2 }
 0xb1c   : > { %v1382_v13 = vadd.f32 %v1381_v12, %v1380_v10 }
 0xb1e   : > { %v1383_v16 = vrot.slane %v1382_v13, 1 }
 0xb20   : > { %v1384_v17 = vadd.f32 %v1383_v16, %v1382_v13 }
 0xb22   : > { %1721 = vpush %v1384_v17 }
 0xb23   : > { %1723 = vpush %v1396_v18 }
 0xb53   : > { %s1722_s18 = spop %1721 }
 0xb54   : > { %v1386_v21 = vstv %s1722_s18  ;;  %s1724_s2 = spop %1723  ;;  %s1882_s18 = scalar_lea.vmem %s1881_s8, 32 }
 0xb55   : > { %1387 = vst [vmem:[%s675_s21] sm:$0x1] %v1386_v21  ;;  %v1398_v22 = vstv %s1724_s2  ;;  %p1884_p10 = scmp.lt.s32.totalorder %s1882_s18, %s1876_s27 }
 0xb56   : > { %1399 = vst [vmem:[%s681_s6] sm:$0x1] %v1398_v22 }
 0xb57   : > { %p1885_p2 = por %p1884_p10, %p1883_p8 }
 0xb59   : > { %p1886_p4 = pnand %p1885_p2, %p1879_p5 }
 0xb5b   : > { %1889 = shalt.err (!%p1886_p4)
}
 0xb5c   : > { %s1890_s23 = scalar_lea.hbm %s2399_s28, 16  ;;  %s1894_s21 = scalar_lea.hbm %s2548_s3, 32 }
 0xb5d   : > { %p1891_p9 = scmp.ne.s32.totalorder %s2399_s28, %s1890_s23  ;;  %p1895_p6 = scmp.lt.s32.totalorder %s2399_s28, %s2548_s3 }
 0xb5e   : > { %p1896_p11 = scmp.lt.s32.totalorder %s1894_s21, %s1890_s23 }
 0xb5f   : > { %p1892_p7 = pnand %p1891_p9, %p2547_p13 }
 0xb60   : > { %p1897_p12 = por %p1896_p11, %p1895_p6 }
 0xb61   : > { %p1893_p0 = pneg %p1892_p7 }
 0xb63   : > { %p1898_p1 = pnand %p1897_p12, %p1893_p0 }
 0xb65   : > { %1901 = shalt.err (!%p1898_p1)
}
 0xb66   : > { %1728 = dma.vmem_to_hbm [thread:$0]  (%p2547_p13), %s2401_s26, 16, %s2399_s28, %s2409_s4  }
 0xb67   : > { %s1902_s8 = scalar_lea.vmem %s2393_s7, 16  ;;  %s1978_s29 = smov [#allocation8]  }
 0xb68   : > { %p1903_p3 = scmp.ne.s32.totalorder %s2393_s7, %s1902_s8  ;;  %s1906_s27 = sshll.u32 %s1978_s29, 4  ;;  %s1907_s27 = int_to_ptr.vmem [resolvable:$false] %s1906_s27 }
 0xb69   : > { %s1908_s1 = scalar_lea.vmem %s1907_s27, 32  ;;  %p1909_p10 = scmp.lt.s32.totalorder %s2393_s7, %s1907_s27 }
 0xb6a   : > { %p1904_p5 = pnand %p1903_p3, %p2547_p13  ;;  %p1910_p2 = scmp.lt.s32.totalorder %s1908_s1, %s1902_s8 }
 0xb6c   : > { %p1905_p8 = pneg %p1904_p5  ;;  %p1911_p4 = por %p1910_p2, %p1909_p10 }
 0xb6e   : > { %p1912_p9 = pnand %p1911_p4, %p1905_p8 }
 0xb70   : > { %1915 = shalt.err (!%p1912_p9)
}
 0xb71   : > { %s1916_s18 = scalar_lea.hbm %s2407_s0, 16  ;;  %s1920_s23 = scalar_lea.hbm %s2549_s30, 32 }
 0xb72   : > { %p1917_p7 = scmp.ne.s32.totalorder %s2407_s0, %s1916_s18  ;;  %p1921_p11 = scmp.lt.s32.totalorder %s2407_s0, %s2549_s30 }
 0xb73   : > { %p1922_p12 = scmp.lt.s32.totalorder %s1920_s23, %s1916_s18 }
 0xb74   : > { %p1918_p0 = pnand %p1917_p7, %p2547_p13 }
 0xb75   : > { %p1923_p1 = por %p1922_p12, %p1921_p11 }
 0xb76   : > { %p1919_p6 = pneg %p1918_p0 }
 0xb78   : > { %p1924_p3 = pnand %p1923_p1, %p1919_p6 }
 0xb7a   : > { %1927 = shalt.err (!%p1924_p3)
}
 0xb7b   : > { %1729 = dma.vmem_to_hbm [thread:$0]  (%p2547_p13), %s2393_s7, 16, %s2407_s0, %s2409_s4  }
 0xb7c PF: > { %s2550_s21 = sld [smem:[#allocation12_spill]]  ;;  %p2553_p8 = scmp.ge.s32.totalorder %s1970_s24, 2 }
 0xb7d   : > { %s2551_s2 = sld [smem:[#allocation17_spill]] }
 0xb82   : > { %s1459_s19 = sand.u32 1, %s2550_s21  }
 0xb83   : > { %p2552_p5 = scmp.ne.s32.totalorder %s2551_s2, 0  ;;  %s1460_s8 = scalar_lea.sflag [#allocation4], %s1459_s19 }
 0xb85   : > { %p1738_p10 = pnand %p2553_p8, %p2552_p5 }
 0xb87   : > { %p1739_p2 = pneg %p1738_p10 }
 0xb89   : > { %1949 = dma.done.wait (%p1739_p2), %s1460_s8, 16  }
 0xb8a   : > { %1951 = vsyncadd (%p1739_p2), %s1460_s8, 4294967280  ;;  %s2554_s29 = sadd.s32 4294967294, %s1970_s24  }
 0xb8b   : > { %s1467_s27 = sand.u32 1, %s2554_s29  }
 0xb8c   : > { %s1468_s25 = scalar_lea.sflag [#allocation7], %s1467_s27 }
 0xb8d   : > { %1953 = dma.done.wait (%p1739_p2), %s1468_s25, 32  }
 0xb8e   : > { %1955 = vsyncadd (%p1739_p2), %s1468_s25, 4294967264  ;;  %s2555_s24 = sld [smem:[#allocation14_spill]]  ;;  %s2558_s1 = smov %s1962_s22 }
 0xb8f   : > { %s2556_s4 = sld [smem:[#allocation13_spill]] }
 0xb90   : > { %s2557_s23 = sld [smem:[#allocation15_spill]] }
 0xb94   : > { %p37_p13 = scmp.ge.s32.totalorder %s2555_s24, 4  }
 0xb95   : > { %s2559_s22 = smov %s2556_s4 }
 0xb96   :  { %39 = sbr.rel (!%p37_p13) target bundleno = 20 (0x14), region = 175 }
 0xb9b   :  { %1480 = vsyncpa [#allocation3], 1 }
 0xb9c   :  { %1482 = vsyncpa [#allocation3 + $0x1], 1 }
 0xb9d   :  { %1483 = vsyncpa [#allocation4], 1 }
 0xb9e   :  { %1485 = vsyncpa [#allocation4 + $0x1], 1 }
 0xb9f   :  { %1486 = vsyncpa [#allocation7], 1 }
 0xba0   :  { %1488 = vsyncpa [#allocation7 + $0x1], 1 }

</bundles_post_ra>
